<compile_context>
chip_gen: v5e
topology: v5e:2x2
jax: 0.10.0
libtpu: 0.0.40
codegen_flags: <defaults>
</compile_context>

<pallas_src>
import jax
import jax.numpy as jnp
from jax.experimental import pallas as pl
from jax.experimental.pallas import tpu as pltpu

_BF16 = jnp.bfloat16
_F32 = jnp.float32


def _make_kernel(row_tile):
    def kernel(x_ref, a_ref, p_ref, wa0_ref, wfirst_ref, wb_ref, vec_ref,
               w1_ref, b1_ref, w2_ref, b2_ref, out_ref,
               hw_ref, h_ref, pooled_ref, acc_ref):
        l = pl.program_id(0)           # layer index          (outer, sequential)
        i = pl.program_id(1)           # node row-block index (inner, sequential)
        nl = pl.num_programs(0)
        nb = pl.num_programs(1)

        # ---- layer prologue (first row block): hW = h_in @ W_a^{(l)} for ALL rows ----
        @pl.when(i == 0)
        def _prologue():
            pooled_ref[...] = jnp.zeros_like(pooled_ref)

            @pl.when(l == 0)
            def _():
                acc_ref[...] = jnp.zeros_like(acc_ref)
                hw_ref[...] = jnp.dot(
                    x_ref[...], wa0_ref[...],
                    preferred_element_type=_F32).astype(_BF16)

            @pl.when(l > 0)
            def _():
                hw_ref[...] = jnp.dot(
                    h_ref[...], wfirst_ref[0],
                    preferred_element_type=_F32).astype(_BF16)

        vecs = vec_ref[0]                           # [4, H] f32
        ba, bb = vecs[0:1, :], vecs[1:2, :]
        sc, sh = vecs[2:3, :], vecs[3:4, :]         # folded eval-mode BN

        row0 = pl.multiple_of(i * row_tile, row_tile)
        hw_blk = hw_ref[pl.ds(row0, row_tile), :]   # [tm, H] bf16

        # GINConv (train_eps=False, eps=0):
        #   relu((x_i + sum_{j->i} x_j) @ W_a + b_a)  ==  relu(A@hW + hW_i + b_a)
        agg = (jnp.dot(a_ref[...], hw_ref[...], preferred_element_type=_F32)
               + hw_blk.astype(_F32) + ba)
        z = jnp.maximum(agg, 0.0)
        z = jnp.maximum(
            jnp.dot(z.astype(_BF16), wb_ref[0],
                    preferred_element_type=_F32) + bb, 0.0)
        hf = z * sc + sh                            # f32 [tm, H]

        # Next layer's input.  Safe to overwrite: this layer only reads hw_ref.
        h_ref[pl.ds(row0, row_tile), :] = hf.astype(_BF16)

        # global_mean_pool contribution of this row block (P is row-normalised).
        pooled_ref[...] += jnp.dot(p_ref[...], hf.astype(_BF16),
                                   preferred_element_type=_F32)

        # ---- layer epilogue: JK('cat') + lin1 reassociated as per-layer accumulation ----
        @pl.when(i == nb - 1)
        def _epilogue():
            acc_ref[...] += jnp.dot(pooled_ref[...].astype(_BF16), w1_ref[0],
                                    preferred_element_type=_F32)

        # ---- head: +b1/ReLU -> (dropout = identity in eval) -> lin2 -> log_softmax ----
        @pl.when(jnp.logical_and(l == nl - 1, i == nb - 1))
        def _head():
            y = jnp.maximum(acc_ref[...] + b1_ref[...], 0.0)
            # TODO(synk): dropout(p=0.5) is the identity here (eval mode); training RNG not implemented.
            y = jnp.dot(y.astype(_BF16), w2_ref[...],
                        preferred_element_type=_F32) + b2_ref[...]
            m = jnp.max(y, axis=-1, keepdims=True)
            lse = jnp.log(jnp.sum(jnp.exp(y - m), axis=-1, keepdims=True)) + m
            out_ref[...] = y - lse

    return kernel


def pack_params(layer_params, w1, b1, w2, b2):
    """One-time per-model packing: bf16 weight slabs, f32 per-channel vectors,
    eval-mode BatchNorm folded into (scale, shift).  Called OUTSIDE the jitted path."""
    num_layers = len(layer_params)
    hidden = w1.shape[1]
    wa0 = layer_params[0][0].astype(_BF16)                               # [F, H]
    wfirst = jnp.stack(                                                  # [L, H, H]; slot 0 unused
        [jnp.zeros((hidden, hidden), _F32)]
        + [layer_params[l][0] for l in range(1, num_layers)]).astype(_BF16)
    wb = jnp.stack([lp[2] for lp in layer_params]).astype(_BF16)         # [L, H, H]
    vec = jnp.stack([jnp.concatenate([lp[1], lp[3], lp[4], lp[5]], axis=0)
                     for lp in layer_params]).astype(_F32)               # [L, 4, H]
    w1s = w1.reshape(num_layers, hidden, hidden).astype(_BF16)           # w1[l*H:(l+1)*H] == w1s[l]
    return dict(wa0=wa0, wfirst=wfirst, wb=wb, vec=vec, w1=w1s,
                b1=b1.astype(_F32), w2=w2.astype(_BF16), b2=b2.astype(_F32))


def gin0_with_jk_forward(x, a, p, packed, *, row_tile=128):
    """x: [N, F] bf16 node features, a: [N, N] bf16 raw adjacency (A[dst, src]),
    p: [G, N] bf16 row-normalised mean-pooling matrix, packed: output of pack_params."""
    n, f = x.shape
    g = p.shape[0]
    num_layers, _, hidden = packed["wb"].shape
    c = packed["w2"].shape[1]

    tm = row_tile if (n % row_tile == 0 and n >= row_tile) else n
    nb = n // tm
    grid = (num_layers, nb)

    in_specs = [
        pl.BlockSpec((n, f), lambda l, i: (0, 0)),                     # x (resident)
        pl.BlockSpec((tm, n), lambda l, i: (i, 0)),                    # A row tile (streamed)
        pl.BlockSpec((g, tm), lambda l, i: (0, i)),                    # P column tile
        pl.BlockSpec((f, hidden), lambda l, i: (0, 0)),                # W_a layer 0
        pl.BlockSpec((1, hidden, hidden), lambda l, i: (l, 0, 0)),     # W_a layers > 0
        pl.BlockSpec((1, hidden, hidden), lambda l, i: (l, 0, 0)),     # W_b
        pl.BlockSpec((1, 4, hidden), lambda l, i: (l, 0, 0)),          # [b_a; b_b; bn_sc; bn_sh]
        pl.BlockSpec((1, hidden, hidden), lambda l, i: (l, 0, 0)),     # lin1 slice for layer l
        pl.BlockSpec((1, hidden), lambda l, i: (0, 0)),                # b1
        pl.BlockSpec((hidden, c), lambda l, i: (0, 0)),                # w2
        pl.BlockSpec((1, c), lambda l, i: (0, 0)),                     # b2
    ]
    out_specs = pl.BlockSpec((g, c), lambda l, i: (0, 0))

    scratch_shapes = [
        pltpu.VMEM((n, hidden), _BF16),   # hW  (current layer, all rows)
        pltpu.VMEM((n, hidden), _BF16),   # h   (layer output == next layer's input)
        pltpu.VMEM((g, hidden), _F32),    # per-layer pooled accumulator
        pltpu.VMEM((g, hidden), _F32),    # JK/lin1 accumulator
    ]

    # Roofline hints for XLA's scheduler around the custom call.
    flops = (num_layers * 2 * n * n * hidden
             + 2 * n * f * hidden
             + (num_layers - 1) * 2 * n * hidden * hidden
             + num_layers * 2 * n * hidden * hidden
             + num_layers * 2 * g * n * hidden
             + num_layers * 2 * g * hidden * hidden
             + 2 * g * hidden * c)
    bytes_accessed = (num_layers * n * n * 2                       # A streamed once per layer
                      + n * f * 2 + num_layers * g * n * 2         # x + P
                      + (f * hidden + 3 * num_layers * hidden * hidden + hidden * c) * 2
                      + num_layers * 4 * hidden * 4 + (hidden + c) * 4 + g * c * 4)
    cost = pl.CostEstimate(flops=int(flops), transcendentals=int(g * c),
                           bytes_accessed=int(bytes_accessed))

    # Double-buffered A/P tiles + resident x/hW/h + weights, with headroom.
    # (48 MiB stays below v7x's 64 MiB physical VMEM; shrink row_tile for very large N.)
    vmem_est = (4 * tm * n * 2 + 4 * g * tm * 2 + 2 * n * f * 2
                + 2 * n * hidden * 2 + 2 * (1 << 20))
    vmem_limit = min(max(vmem_est, 32 * 1024 * 1024), 48 * 1024 * 1024)

    # Both grid axes must stay "arbitrary": the layer axis is a true sequence, and the
    # row blocks share the resident hW/h scratch and the pooled/lin1 accumulators, so
    # they cannot be sharded across TensorCores in this fused single-call form.
    # TODO(synk): v7x dual-TC sharding would need per-layer pallas_calls with a parallel row grid.
    return pl.pallas_call(
        _make_kernel(tm),
        out_shape=jax.ShapeDtypeStruct((g, c), _F32),
        grid=grid,
        in_specs=in_specs,
        out_specs=out_specs,
        scratch_shapes=scratch_shapes,
        compiler_params=pltpu.CompilerParams(
            dimension_semantics=("arbitrary", "arbitrary"),
            vmem_limit_bytes=int(vmem_limit)),
        cost_estimate=cost,
    )(x, a, p, packed["wa0"], packed["wfirst"], packed["wb"], packed["vec"],
      packed["w1"], packed["b1"], packed["w2"], packed["b2"])


def _reference_forward_mirror(x, a, p, layer_params, w1, b1, w2, b2):
    """Pure-JAX reference mirroring the kernel's exact bf16 quantization + reassociation."""
    hidden = w1.shape[1]

    def mm(lhs, rhs):
        return jnp.dot(lhs.astype(_BF16), rhs.astype(_BF16),
                       preferred_element_type=_F32)

    h = x
    acc = jnp.zeros((p.shape[0], hidden), _F32)
    for idx, (wa, ba, wb, bb, sc, sh) in enumerate(layer_params):
        hw = mm(h, wa).astype(_BF16)
        agg = mm(a, hw) + hw.astype(_F32) + ba
        z = jnp.maximum(agg, 0.0)
        z = jnp.maximum(mm(z, wb) + bb, 0.0)
        hf = z * sc + sh
        h = hf.astype(_BF16)
        pooled = mm(p, hf)
        acc = acc + mm(pooled, w1[idx * hidden:(idx + 1) * hidden, :])
    y = jnp.maximum(acc + b1, 0.0)
    y = mm(y, w2) + b2
    return y - jax.scipy.special.logsumexp(y, axis=-1, keepdims=True)


def _reference_forward_f32(x, a, p, layer_params, w1, b1, w2, b2):
    """Pure-f32 reference of the original module (eval mode)."""
    hi = jax.lax.Precision.HIGHEST

    def mm(lhs, rhs):
        return jnp.dot(lhs, rhs, precision=hi, preferred_element_type=_F32)

    h = x
    xs = []
    for (wa, ba, wb, bb, sc, sh) in layer_params:
        agg = mm(a, h) + h
        z = jnp.maximum(mm(agg, wa) + ba, 0.0)
        z = jnp.maximum(mm(z, wb) + bb, 0.0)
        h = z * sc + sh
        xs.append(h)
    xcat = jnp.concatenate(xs, axis=-1)
    pooled = mm(p, xcat)
    y = jnp.maximum(mm(pooled, w1) + b1, 0.0)
    y = mm(y, w2) + b2
    return y - jax.scipy.special.logsumexp(y, axis=-1, keepdims=True)


def _init_params(key, num_features, hidden, num_layers, num_classes):
    keys = iter(jax.random.split(key, 8 * num_layers + 8))

    def lin(fan_in, fan_out):
        w = 0.1 * jax.random.normal(next(keys), (fan_in, fan_out), _F32)
        b = 0.1 * jax.random.normal(next(keys), (1, fan_out), _F32)
        return w, b

    layer_params = []
    in_dim = num_features
    for _ in range(num_layers):
        wa, ba = lin(in_dim, hidden)
        wb, bb = lin(hidden, hidden)
        gamma = 1.0 + 0.1 * jax.random.normal(next(keys), (1, hidden), _F32)
        beta = 0.1 * jax.random.normal(next(keys), (1, hidden), _F32)
        run_mean = 0.1 * jax.random.normal(next(keys), (1, hidden), _F32)
        run_var = 0.5 + jnp.abs(jax.random.normal(next(keys), (1, hidden), _F32))
        scale = gamma / jnp.sqrt(run_var + 1e-5)        # fold eval-mode BN into affine
        shift = beta - run_mean * scale
        layer_params.append((wa, ba, wb, bb, scale, shift))
        in_dim = hidden

    w1, b1 = lin(num_layers * hidden, hidden)
    w2, b2 = lin(hidden, num_classes)
    return layer_params, w1, b1, w2, b2


if __name__ == "__main__":
    # Synthetic GIN-shaped problem; N = 256 exercises two 128-row A tiles.
    N = 256           # nodes (8 graphs x 32 nodes)
    F = 16            # dataset.num_features
    H = 32            # hidden
    L = 3             # num_layers
    G = 8             # graphs in the batch
    C = 4             # dataset.num_classes
    E = 512           # edges
    npg = N // G

    key = jax.random.PRNGKey(0)
    k_x, k_g, k_src, k_dst, k_par = jax.random.split(key, 5)

    x = jax.random.normal(k_x, (N, F), _F32)

    # Intra-graph random edges -> dense adjacency: A[dst, src] += 1
    eg = jax.random.randint(k_g, (E,), 0, G)
    src = eg * npg + jax.random.randint(k_src, (E,), 0, npg)
    dst = eg * npg + jax.random.randint(k_dst, (E,), 0, npg)
    a = jnp.zeros((N, N), _F32).at[dst, src].add(1.0)

    # batch assignment -> mean-pooling matrix P [G, N]
    batch = jnp.repeat(jnp.arange(G, dtype=jnp.int32), npg)
    onehot = (batch[None, :] == jnp.arange(G, dtype=jnp.int32)[:, None]).astype(_F32)
    p = onehot / jnp.sum(onehot, axis=1, keepdims=True)

    layer_params, w1, b1, w2, b2 = _init_params(k_par, F, H, L, C)

    # One-time preprocessing (hoisted out of the per-call path, per the perf review).
    packed = pack_params(layer_params, w1, b1, w2, b2)
    x_bf = x.astype(_BF16)
    a_bf = a.astype(_BF16)      # raw adjacency; no A+I materialization
    p_bf = p.astype(_BF16)

    fwd = jax.jit(gin0_with_jk_forward)
    out = jax.block_until_ready(fwd(x_bf, a_bf, p_bf, packed))

    ref_bf16 = _reference_forward_mirror(x, a, p, layer_params, w1, b1, w2, b2)
    ref_f32 = _reference_forward_f32(x, a, p, layer_params, w1, b1, w2, b2)

    assert out.shape == (G, C)
    assert bool(jnp.all(jnp.isfinite(out)))
    # tight check vs a reference using the identical bf16 quantization / reassociation
    assert bool(jnp.allclose(out, ref_bf16, rtol=5e-3, atol=5e-3))
    # looser sanity check vs the pure-f32 reference (bf16 rounding only)
    assert bool(jnp.allclose(out, ref_f32, rtol=3e-2, atol=3e-2))

    print("KERNEL_OK")
</pallas_src>

<mosaic_0001>
module attributes {stable_mosaic.version = 11 : i64} {
  func.func @kernel(%arg0: i32, %arg1: i32, %arg2: memref<256x16xbf16, #tpu.memory_space<vmem>>, %arg3: memref<128x256xbf16, #tpu.memory_space<vmem>>, %arg4: memref<8x128xbf16, #tpu.memory_space<vmem>>, %arg5: memref<16x32xbf16, #tpu.memory_space<vmem>>, %arg6: memref<1x32x32xbf16, #tpu.memory_space<vmem>>, %arg7: memref<1x32x32xbf16, #tpu.memory_space<vmem>>, %arg8: memref<1x4x32xf32, #tpu.memory_space<vmem>>, %arg9: memref<1x32x32xbf16, #tpu.memory_space<vmem>>, %arg10: memref<1x32xf32, #tpu.memory_space<vmem>>, %arg11: memref<32x4xbf16, #tpu.memory_space<vmem>>, %arg12: memref<1x4xf32, #tpu.memory_space<vmem>>, %arg13: memref<8x4xf32, #tpu.memory_space<vmem>>, %arg14: memref<256x32xbf16, #tpu.memory_space<vmem>>, %arg15: memref<256x32xbf16, #tpu.memory_space<vmem>>, %arg16: memref<8x32xf32, #tpu.memory_space<vmem>>, %arg17: memref<8x32xf32, #tpu.memory_space<vmem>>) attributes {dimension_semantics = [#tpu.dimension_semantics<arbitrary>, #tpu.dimension_semantics<arbitrary>], iteration_bounds = array<i64: 3, 2>, scalar_prefetch = 0 : i64, scratch_operands = 4 : i64, tpu.core_type = #tpu.core_type<tc>, window_params = [{pipeline_mode = #tpu.pipeline_mode<synchronous>, transform_indices = @transform_0, window_bounds = array<i64: 256, 16>}, {transform_indices = @transform_1, window_bounds = array<i64: 128, 256>}, {transform_indices = @transform_2, window_bounds = array<i64: 8, 128>}, {pipeline_mode = #tpu.pipeline_mode<synchronous>, transform_indices = @transform_3, window_bounds = array<i64: 16, 32>}, {transform_indices = @transform_4, window_bounds = array<i64: 1, 32, 32>}, {transform_indices = @transform_5, window_bounds = array<i64: 1, 32, 32>}, {transform_indices = @transform_6, window_bounds = array<i64: 1, 4, 32>}, {transform_indices = @transform_7, window_bounds = array<i64: 1, 32, 32>}, {pipeline_mode = #tpu.pipeline_mode<synchronous>, transform_indices = @transform_8, window_bounds = array<i64: 1, 32>}, {pipeline_mode = #tpu.pipeline_mode<synchronous>, transform_indices = @transform_9, window_bounds = array<i64: 32, 4>}, {pipeline_mode = #tpu.pipeline_mode<synchronous>, transform_indices = @transform_10, window_bounds = array<i64: 1, 4>}, {pipeline_mode = #tpu.pipeline_mode<synchronous>, transform_indices = @transform_11, window_bounds = array<i64: 8, 4>}]} {
    %c0_i32 = arith.constant 0 : i32
    %0 = arith.cmpi eq, %arg1, %c0_i32 : i32
    %1 = arith.extui %0 : i1 to i32
    %c0_i32_0 = arith.constant 0 : i32
    %2 = arith.cmpi ne, %1, %c0_i32_0 : i32
    scf.if %2 {
      %cst_25 = arith.constant 0.000000e+00 : f32
      %51 = vector.broadcast %cst_25 : f32 to vector<8x32xf32>
      %c0_26 = arith.constant 0 : index
      %c0_27 = arith.constant 0 : index
      %52 = vector.load %arg16[%c0_26, %c0_27] : memref<8x32xf32, #tpu.memory_space<vmem>>, vector<8x32xf32>
      tpu.vector_store %arg16[%c0_26, %c0_27], %51 {strides = array<i32>} : memref<8x32xf32, #tpu.memory_space<vmem>>, vector<8x32xf32>,
      %c0_i32_28 = arith.constant 0 : i32
      %53 = arith.cmpi eq, %arg0, %c0_i32_28 : i32
      %54 = arith.extui %53 : i1 to i32
      %c0_i32_29 = arith.constant 0 : i32
      %55 = arith.cmpi ne, %54, %c0_i32_29 : i32
      scf.if %55 {
        %cst_32 = arith.constant 0.000000e+00 : f32
        %59 = vector.broadcast %cst_32 : f32 to vector<8x32xf32>
        %c0_33 = arith.constant 0 : index
        %c0_34 = arith.constant 0 : index
        %60 = vector.load %arg17[%c0_33, %c0_34] : memref<8x32xf32, #tpu.memory_space<vmem>>, vector<8x32xf32>
        tpu.vector_store %arg17[%c0_33, %c0_34], %59 {strides = array<i32>} : memref<8x32xf32, #tpu.memory_space<vmem>>, vector<8x32xf32>,
        %c0_35 = arith.constant 0 : index
        %c0_36 = arith.constant 0 : index
        %61 = vector.load %arg2[%c0_35, %c0_36] : memref<256x16xbf16, #tpu.memory_space<vmem>>, vector<256x16xbf16>
        %c0_37 = arith.constant 0 : index
        %c0_38 = arith.constant 0 : index
        %62 = vector.load %arg5[%c0_37, %c0_38] : memref<16x32xbf16, #tpu.memory_space<vmem>>, vector<16x32xbf16>
        %cst_39 = arith.constant dense<0.000000e+00> : vector<256x32xf32>
        %63 = tpu.matmul %61, %62, %cst_39 {dimension_numbers = #tpu.dot_dimension_numbers<[1], [0], [0], [1], [0, 0, 1, 1], [], []>} : vector<256x16xbf16>, vector<16x32xbf16>, vector<256x32xf32> -> vector<256x32xf32>
        %64 = arith.truncf %63 : vector<256x32xf32> to vector<256x32xbf16>
        %c0_40 = arith.constant 0 : index
        %c0_41 = arith.constant 0 : index
        %65 = vector.load %arg14[%c0_40, %c0_41] : memref<256x32xbf16, #tpu.memory_space<vmem>>, vector<256x32xbf16>
        tpu.vector_store %arg14[%c0_40, %c0_41], %64 {strides = array<i32>} : memref<256x32xbf16, #tpu.memory_space<vmem>>, vector<256x32xbf16>,
      } else {
      }
      %c0_i32_30 = arith.constant 0 : i32
      %56 = arith.cmpi sgt, %arg0, %c0_i32_30 : i32
      %57 = arith.extui %56 : i1 to i32
      %c0_i32_31 = arith.constant 0 : i32
      %58 = arith.cmpi ne, %57, %c0_i32_31 : i32
      scf.if %58 {
        %c0_32 = arith.constant 0 : index
        %c0_33 = arith.constant 0 : index
        %59 = vector.load %arg15[%c0_32, %c0_33] : memref<256x32xbf16, #tpu.memory_space<vmem>>, vector<256x32xbf16>
        %c0_34 = arith.constant 0 : index
        %c0_35 = arith.constant 0 : index
        %c0_36 = arith.constant 0 : index
        %60 = vector.load %arg6[%c0_34, %c0_35, %c0_36] : memref<1x32x32xbf16, #tpu.memory_space<vmem>>, vector<1x32x32xbf16>
        %61 = vector.shape_cast %60 : vector<1x32x32xbf16> to vector<32x32xbf16>
        %cst_37 = arith.constant dense<0.000000e+00> : vector<256x32xf32>
        %62 = tpu.matmul %59, %61, %cst_37 {dimension_numbers = #tpu.dot_dimension_numbers<[1], [0], [0], [1], [0, 0, 1, 1], [], []>} : vector<256x32xbf16>, vector<32x32xbf16>, vector<256x32xf32> -> vector<256x32xf32>
        %63 = arith.truncf %62 : vector<256x32xf32> to vector<256x32xbf16>
        %c0_38 = arith.constant 0 : index
        %c0_39 = arith.constant 0 : index
        %64 = vector.load %arg14[%c0_38, %c0_39] : memref<256x32xbf16, #tpu.memory_space<vmem>>, vector<256x32xbf16>
        tpu.vector_store %arg14[%c0_38, %c0_39], %63 {strides = array<i32>} : memref<256x32xbf16, #tpu.memory_space<vmem>>, vector<256x32xbf16>,
      } else {
      }
    } else {
    }
    %c0 = arith.constant 0 : index
    %c0_1 = arith.constant 0 : index
    %c0_2 = arith.constant 0 : index
    %3 = vector.load %arg8[%c0, %c0_1, %c0_2] : memref<1x4x32xf32, #tpu.memory_space<vmem>>, vector<1x4x32xf32>
    %4 = vector.shape_cast %3 : vector<1x4x32xf32> to vector<4x32xf32>
    %5 = vector.extract_strided_slice %4 {offsets = [0, 0], sizes = [1, 32], strides = [1, 1]} : vector<4x32xf32> to vector<1x32xf32>
    %6 = vector.extract_strided_slice %4 {offsets = [1, 0], sizes = [1, 32], strides = [1, 1]} : vector<4x32xf32> to vector<1x32xf32>
    %7 = vector.extract_strided_slice %4 {offsets = [2, 0], sizes = [1, 32], strides = [1, 1]} : vector<4x32xf32> to vector<1x32xf32>
    %8 = vector.extract_strided_slice %4 {offsets = [3, 0], sizes = [1, 32], strides = [1, 1]} : vector<4x32xf32> to vector<1x32xf32>
    %c128_i32 = arith.constant 128 : i32
    %9 = arith.muli %arg1, %c128_i32 : i32
    %10 = tpu.assume_multiple %9, 128 : i32
    %11 = arith.index_cast %10 : i32 to index
    %c0_3 = arith.constant 0 : index
    %12 = vector.load %arg14[%11, %c0_3] : memref<256x32xbf16, #tpu.memory_space<vmem>>, vector<128x32xbf16>
    %c0_4 = arith.constant 0 : index
    %c0_5 = arith.constant 0 : index
    %13 = vector.load %arg3[%c0_4, %c0_5] : memref<128x256xbf16, #tpu.memory_space<vmem>>, vector<128x256xbf16>
    %c0_6 = arith.constant 0 : index
    %c0_7 = arith.constant 0 : index
    %14 = vector.load %arg14[%c0_6, %c0_7] : memref<256x32xbf16, #tpu.memory_space<vmem>>, vector<256x32xbf16>
    %cst = arith.constant dense<0.000000e+00> : vector<128x32xf32>
    %15 = tpu.matmul %13, %14, %cst {dimension_numbers = #tpu.dot_dimension_numbers<[1], [0], [0], [1], [0, 0, 1, 1], [], []>} : vector<128x256xbf16>, vector<256x32xbf16>, vector<128x32xf32> -> vector<128x32xf32>
    %16 = arith.extf %12 : vector<128x32xbf16> to vector<128x32xf32>
    %17 = arith.addf %15, %16 : vector<128x32xf32>
    %18 = vector.broadcast %5 : vector<1x32xf32> to vector<128x32xf32>
    %19 = arith.addf %17, %18 : vector<128x32xf32>
    %cst_8 = arith.constant 0.000000e+00 : f32
    %20 = vector.broadcast %cst_8 : f32 to vector<128x32xf32>
    %21 = arith.maximumf %19, %20 : vector<128x32xf32>
    %22 = arith.truncf %21 : vector<128x32xf32> to vector<128x32xbf16>
    %c0_9 = arith.constant 0 : index
    %c0_10 = arith.constant 0 : index
    %c0_11 = arith.constant 0 : index
    %23 = vector.load %arg7[%c0_9, %c0_10, %c0_11] : memref<1x32x32xbf16, #tpu.memory_space<vmem>>, vector<1x32x32xbf16>
    %24 = vector.shape_cast %23 : vector<1x32x32xbf16> to vector<32x32xbf16>
    %cst_12 = arith.constant dense<0.000000e+00> : vector<128x32xf32>
    %25 = tpu.matmul %22, %24, %cst_12 {dimension_numbers = #tpu.dot_dimension_numbers<[1], [0], [0], [1], [0, 0, 1, 1], [], []>} : vector<128x32xbf16>, vector<32x32xbf16>, vector<128x32xf32> -> vector<128x32xf32>
    %26 = vector.broadcast %6 : vector<1x32xf32> to vector<128x32xf32>
    %27 = arith.addf %25, %26 : vector<128x32xf32>
    %cst_13 = arith.constant 0.000000e+00 : f32
    %28 = vector.broadcast %cst_13 : f32 to vector<128x32xf32>
    %29 = arith.maximumf %27, %28 : vector<128x32xf32>
    %30 = vector.broadcast %7 : vector<1x32xf32> to vector<128x32xf32>
    %31 = arith.mulf %29, %30 : vector<128x32xf32>
    %32 = vector.broadcast %8 : vector<1x32xf32> to vector<128x32xf32>
    %33 = arith.addf %31, %32 : vector<128x32xf32>
    %34 = arith.truncf %33 : vector<128x32xf32> to vector<128x32xbf16>
    %35 = arith.index_cast %10 : i32 to index
    %c0_14 = arith.constant 0 : index
    %36 = vector.load %arg15[%35, %c0_14] : memref<256x32xbf16, #tpu.memory_space<vmem>>, vector<128x32xbf16>
    tpu.vector_store %arg15[%35, %c0_14], %34 {strides = array<i32>} : memref<256x32xbf16, #tpu.memory_space<vmem>>, vector<128x32xbf16>,
    %c0_15 = arith.constant 0 : index
    %c0_16 = arith.constant 0 : index
    %37 = vector.load %arg16[%c0_15, %c0_16] : memref<8x32xf32, #tpu.memory_space<vmem>>, vector<8x32xf32>
    %c0_17 = arith.constant 0 : index
    %c0_18 = arith.constant 0 : index
    %38 = vector.load %arg4[%c0_17, %c0_18] : memref<8x128xbf16, #tpu.memory_space<vmem>>, vector<8x128xbf16>
    %39 = arith.truncf %33 : vector<128x32xf32> to vector<128x32xbf16>
    %cst_19 = arith.constant dense<0.000000e+00> : vector<8x32xf32>
    %40 = tpu.matmul %38, %39, %cst_19 {dimension_numbers = #tpu.dot_dimension_numbers<[1], [0], [0], [1], [0, 0, 1, 1], [], []>} : vector<8x128xbf16>, vector<128x32xbf16>, vector<8x32xf32> -> vector<8x32xf32>
    %41 = arith.addf %37, %40 : vector<8x32xf32>
    %c0_20 = arith.constant 0 : index
    %c0_21 = arith.constant 0 : index
    %42 = vector.load %arg16[%c0_20, %c0_21] : memref<8x32xf32, #tpu.memory_space<vmem>>, vector<8x32xf32>
    tpu.vector_store %arg16[%c0_20, %c0_21], %41 {strides = array<i32>} : memref<8x32xf32, #tpu.memory_space<vmem>>, vector<8x32xf32>,
    %c1_i32 = arith.constant 1 : i32
    %43 = arith.cmpi eq, %arg1, %c1_i32 : i32
    %44 = arith.extui %43 : i1 to i32
    %c0_i32_22 = arith.constant 0 : i32
    %45 = arith.cmpi ne, %44, %c0_i32_22 : i32
    scf.if %45 {
      %c0_25 = arith.constant 0 : index
      %c0_26 = arith.constant 0 : index
      %51 = vector.load %arg17[%c0_25, %c0_26] : memref<8x32xf32, #tpu.memory_space<vmem>>, vector<8x32xf32>
      %c0_27 = arith.constant 0 : index
      %c0_28 = arith.constant 0 : index
      %52 = vector.load %arg16[%c0_27, %c0_28] : memref<8x32xf32, #tpu.memory_space<vmem>>, vector<8x32xf32>
      %53 = arith.truncf %52 : vector<8x32xf32> to vector<8x32xbf16>
      %c0_29 = arith.constant 0 : index
      %c0_30 = arith.constant 0 : index
      %c0_31 = arith.constant 0 : index
      %54 = vector.load %arg9[%c0_29, %c0_30, %c0_31] : memref<1x32x32xbf16, #tpu.memory_space<vmem>>, vector<1x32x32xbf16>
      %55 = vector.shape_cast %54 : vector<1x32x32xbf16> to vector<32x32xbf16>
      %cst_32 = arith.constant dense<0.000000e+00> : vector<8x32xf32>
      %56 = tpu.matmul %53, %55, %cst_32 {dimension_numbers = #tpu.dot_dimension_numbers<[1], [0], [0], [1], [0, 0, 1, 1], [], []>} : vector<8x32xbf16>, vector<32x32xbf16>, vector<8x32xf32> -> vector<8x32xf32>
      %57 = arith.addf %51, %56 : vector<8x32xf32>
      %c0_33 = arith.constant 0 : index
      %c0_34 = arith.constant 0 : index
      %58 = vector.load %arg17[%c0_33, %c0_34] : memref<8x32xf32, #tpu.memory_space<vmem>>, vector<8x32xf32>
      tpu.vector_store %arg17[%c0_33, %c0_34], %57 {strides = array<i32>} : memref<8x32xf32, #tpu.memory_space<vmem>>, vector<8x32xf32>,
    } else {
    }
    %c2_i32 = arith.constant 2 : i32
    %46 = arith.cmpi eq, %arg0, %c2_i32 : i32
    %c1_i32_23 = arith.constant 1 : i32
    %47 = arith.cmpi eq, %arg1, %c1_i32_23 : i32
    %48 = arith.andi %46, %47 : i1
    %49 = arith.extui %48 : i1 to i32
    %c0_i32_24 = arith.constant 0 : i32
    %50 = arith.cmpi ne, %49, %c0_i32_24 : i32
    scf.if %50 {
      %c0_25 = arith.constant 0 : index
      %c0_26 = arith.constant 0 : index
      %51 = vector.load %arg17[%c0_25, %c0_26] : memref<8x32xf32, #tpu.memory_space<vmem>>, vector<8x32xf32>
      %c0_27 = arith.constant 0 : index
      %c0_28 = arith.constant 0 : index
      %52 = vector.load %arg10[%c0_27, %c0_28] : memref<1x32xf32, #tpu.memory_space<vmem>>, vector<1x32xf32>
      %53 = vector.broadcast %52 : vector<1x32xf32> to vector<8x32xf32>
      %54 = arith.addf %51, %53 : vector<8x32xf32>
      %cst_29 = arith.constant 0.000000e+00 : f32
      %55 = vector.broadcast %cst_29 : f32 to vector<8x32xf32>
      %56 = arith.maximumf %54, %55 : vector<8x32xf32>
      %57 = arith.truncf %56 : vector<8x32xf32> to vector<8x32xbf16>
      %c0_30 = arith.constant 0 : index
      %c0_31 = arith.constant 0 : index
      %58 = vector.load %arg11[%c0_30, %c0_31] : memref<32x4xbf16, #tpu.memory_space<vmem>>, vector<32x4xbf16>
      %cst_32 = arith.constant dense<0.000000e+00> : vector<8x4xf32>
      %59 = tpu.matmul %57, %58, %cst_32 {dimension_numbers = #tpu.dot_dimension_numbers<[1], [0], [0], [1], [0, 0, 1, 1], [], []>} : vector<8x32xbf16>, vector<32x4xbf16>, vector<8x4xf32> -> vector<8x4xf32>
      %c0_33 = arith.constant 0 : index
      %c0_34 = arith.constant 0 : index
      %60 = vector.load %arg12[%c0_33, %c0_34] : memref<1x4xf32, #tpu.memory_space<vmem>>, vector<1x4xf32>
      %61 = vector.broadcast %60 : vector<1x4xf32> to vector<8x4xf32>
      %62 = arith.addf %59, %61 : vector<8x4xf32>
      %cst_35 = arith.constant dense<0xFF800000> : vector<8xf32>
      %63 = vector.multi_reduction <maximumf>, %62, %cst_35 [1] : vector<8x4xf32> to vector<8xf32>
      %64 = vector.shape_cast %63 : vector<8xf32> to vector<8x1xf32>
      %65 = vector.broadcast %64 : vector<8x1xf32> to vector<8x4xf32>
      %66 = arith.subf %62, %65 : vector<8x4xf32>
      %67 = math.exp %66 : vector<8x4xf32>
      %cst_36 = arith.constant dense<0.000000e+00> : vector<8xf32>
      %68 = vector.multi_reduction <add>, %67, %cst_36 [1] : vector<8x4xf32> to vector<8xf32>
      %69 = vector.shape_cast %68 : vector<8xf32> to vector<8x1xf32>
      %70 = math.log %69 : vector<8x1xf32>
      %71 = arith.addf %70, %64 : vector<8x1xf32>
      %72 = vector.broadcast %71 : vector<8x1xf32> to vector<8x4xf32>
      %73 = arith.subf %62, %72 : vector<8x4xf32>
      %c0_37 = arith.constant 0 : index
      %c0_38 = arith.constant 0 : index
      %74 = vector.load %arg13[%c0_37, %c0_38] : memref<8x4xf32, #tpu.memory_space<vmem>>, vector<8x4xf32>
      tpu.vector_store %arg13[%c0_37, %c0_38], %73 {strides = array<i32>} : memref<8x4xf32, #tpu.memory_space<vmem>>, vector<8x4xf32>,
    } else {
    }
    return
  }
  func.func @transform_0(%arg0: i32, %arg1: i32) -> (i32, i32) {
    %c0_i32 = arith.constant 0 : i32
    %c0_i32_0 = arith.constant 0 : i32
    %c0_i32_1 = arith.constant 0 : i32
    return %c0_i32, %c0_i32_0 : i32, i32
  }
  func.func @transform_1(%arg0: i32, %arg1: i32) -> (i32, i32) {
    %c0_i32 = arith.constant 0 : i32
    %c0_i32_0 = arith.constant 0 : i32
    return %arg1, %c0_i32 : i32, i32
  }
  func.func @transform_2(%arg0: i32, %arg1: i32) -> (i32, i32) {
    %c0_i32 = arith.constant 0 : i32
    %c0_i32_0 = arith.constant 0 : i32
    return %c0_i32, %arg1 : i32, i32
  }
  func.func @transform_3(%arg0: i32, %arg1: i32) -> (i32, i32) {
    %c0_i32 = arith.constant 0 : i32
    %c0_i32_0 = arith.constant 0 : i32
    %c0_i32_1 = arith.constant 0 : i32
    return %c0_i32, %c0_i32_0 : i32, i32
  }
  func.func @transform_4(%arg0: i32, %arg1: i32) -> (i32, i32, i32) {
    %c0_i32 = arith.constant 0 : i32
    %c0_i32_0 = arith.constant 0 : i32
    %c0_i32_1 = arith.constant 0 : i32
    return %arg0, %c0_i32, %c0_i32_0 : i32, i32, i32
  }
  func.func @transform_5(%arg0: i32, %arg1: i32) -> (i32, i32, i32) {
    %c0_i32 = arith.constant 0 : i32
    %c0_i32_0 = arith.constant 0 : i32
    %c0_i32_1 = arith.constant 0 : i32
    return %arg0, %c0_i32, %c0_i32_0 : i32, i32, i32
  }
  func.func @transform_6(%arg0: i32, %arg1: i32) -> (i32, i32, i32) {
    %c0_i32 = arith.constant 0 : i32
    %c0_i32_0 = arith.constant 0 : i32
    %c0_i32_1 = arith.constant 0 : i32
    return %arg0, %c0_i32, %c0_i32_0 : i32, i32, i32
  }
  func.func @transform_7(%arg0: i32, %arg1: i32) -> (i32, i32, i32) {
    %c0_i32 = arith.constant 0 : i32
    %c0_i32_0 = arith.constant 0 : i32
    %c0_i32_1 = arith.constant 0 : i32
    return %arg0, %c0_i32, %c0_i32_0 : i32, i32, i32
  }
  func.func @transform_8(%arg0: i32, %arg1: i32) -> (i32, i32) {
    %c0_i32 = arith.constant 0 : i32
    %c0_i32_0 = arith.constant 0 : i32
    %c0_i32_1 = arith.constant 0 : i32
    return %c0_i32, %c0_i32_0 : i32, i32
  }
  func.func @transform_9(%arg0: i32, %arg1: i32) -> (i32, i32) {
    %c0_i32 = arith.constant 0 : i32
    %c0_i32_0 = arith.constant 0 : i32
    %c0_i32_1 = arith.constant 0 : i32
    return %c0_i32, %c0_i32_0 : i32, i32
  }
  func.func @transform_10(%arg0: i32, %arg1: i32) -> (i32, i32) {
    %c0_i32 = arith.constant 0 : i32
    %c0_i32_0 = arith.constant 0 : i32
    %c0_i32_1 = arith.constant 0 : i32
    return %c0_i32, %c0_i32_0 : i32, i32
  }
  func.func @transform_11(%arg0: i32, %arg1: i32) -> (i32, i32) {
    %c0_i32 = arith.constant 0 : i32
    %c0_i32_0 = arith.constant 0 : i32
    %c0_i32_1 = arith.constant 0 : i32
    return %c0_i32, %c0_i32_0 : i32, i32
  }
}

</mosaic_0001>

<bundles_post_ra>
// kernel: gin0_with_jk_forward.1
= control target key start
LH: loop header
LB: loop body
LE: loop exit
PB: predicated region body
PF: predicated region fallthrough
CT: control target
= control target key end

     0   :  { %s3663_s0 = inlined_call_operand.vmem [shape: bf16[256,16], index: 0, kind: input, shape index: {}]   ;;  %s3664_s1 = inlined_call_operand.hbm [shape: bf16[256,256], index: 1, kind: input, shape index: {}]   ;;  %s3665_s2 = inlined_call_operand.hbm [shape: bf16[8,256], index: 2, kind: input, shape index: {}]   ;;  %s3666_s3 = inlined_call_operand.vmem [shape: bf16[16,32], index: 3, kind: input, shape index: {}]   ;;  %s3667_s4 = inlined_call_operand.vmem [shape: bf16[3,32,32], index: 4, kind: input, shape index: {}]   ;;  %s3668_s5 = inlined_call_operand.vmem [shape: bf16[3,32,32], index: 5, kind: input, shape index: {}]   ;;  %s3669_s6 = inlined_call_operand.hbm [shape: f32[3,4,32], index: 6, kind: input, shape index: {}]   ;;  %s3670_s7 = inlined_call_operand.vmem [shape: bf16[3,32,32], index: 7, kind: input, shape index: {}]   ;;  %s3671_s8 = inlined_call_operand.vmem [shape: f32[1,32], index: 8, kind: input, shape index: {}]   ;;  %s3672_s9 = inlined_call_operand.vmem [shape: bf16[32,4], index: 9, kind: input, shape index: {}]   ;;  %s3673_s10 = inlined_call_operand.hbm [shape: f32[1,4], index: 10, kind: input, shape index: {}]   ;;  %s3674_s11 = inlined_call_operand.vmem [shape: f32[8,4], index: 11, kind: output, shape index: {}]  }
   0x1   :  { %3682 = sst [smem:[#allocation22_spill]] %s3663_s0 }
   0x2   :  { %3683 = sst [smem:[#allocation23_spill]] %s3665_s2 }
   0x3   :  { %3684 = sst [smem:[#allocation24_spill]] %s3666_s3 }
   0x4   :  { %3685 = sst [smem:[#allocation25_spill]] %s3667_s4 }
   0x5   :  { %3686 = sst [smem:[#allocation26_spill]] %s3668_s5 }
   0x6   :  { %3687 = sst [smem:[#allocation27_spill]] %s3670_s7 }
   0x7   :  { %3688 = sst [smem:[#allocation28_spill]] %s3671_s8 }
   0x8   :  { %3689 = sst [smem:[#allocation29_spill]] %s3672_s9 }
   0x9   :  { %3690 = sst [smem:[#allocation30_spill]] %s3673_s10 }
   0xa   :  { %3691 = sst [smem:[#allocation31_spill]] %s3674_s11 }
   0xb   :  { %16 = vsyncpa [#allocation7], 0 }
   0xc   :  { %18 = vsyncpa [#allocation7 + $0x1], 0 }
   0xd   :  { %19 = vsyncpa [#allocation9], 0 }
   0xe   :  { %21 = vsyncpa [#allocation9 + $0x1], 0 }
   0xf   :  { %22 = vsyncpa [#allocation12], 0  ;;  %s3041_s17 = smov 0   ;;  %s3043_s18 = smov 0  }
  0x10   :  { %s3045_s19 = smov 0   ;;  %s3047_s20 = smov 0  }
  0x11   :  { %s3049_s21 = smov 0   ;;  %s3051_s22 = smov 0  }
  0x12   :  { %s3053_s23 = smov 0   ;;  %s3055_s24 = smov 0  }
  0x13   :  { %s3057_s25 = smov 0   ;;  %s3059_s26 = smov 0  }
  0x14   :  { %s3061_s27 = smov 0  }
  0x15 LB: > { %3692 = sst [smem:[#allocation17_spill]] %s2954_s22  ;;  %s37_s28 = sadd.s32 1, %s2966_s25  ;;  %s2974_s27 = sphi %s3061_s27, %s28_s27   ;;  %s2970_s26 = sphi %s3059_s26, %s3731_s26   ;;  %s2966_s25 = sphi %s3057_s25, %s3730_s25   ;;  %s2962_s24 = sphi %s3055_s24, %s3729_s24   ;;  %s2958_s23 = sphi %s3053_s23, %s3728_s23   ;;  %s2954_s22 = sphi %s3051_s22, %s3719_s22   ;;  %s2950_s21 = sphi %s3049_s21, %s3727_s21   ;;  %s2946_s20 = sphi %s3047_s20, %s3726_s20   ;;  %s2942_s19 = sphi %s3045_s19, %s3725_s19   ;;  %s2938_s18 = sphi %s3043_s18, %s3724_s18   ;;  %s2934_s17 = sphi %s3041_s17, %s3723_s17  }
  0x16   : > { %3693 = sst [smem:[#allocation18_spill]] %s2958_s23  ;;  %s68_s29 = sadd.s32 1, %s2954_s22 }
  0x17   : > { %3694 = sst [smem:[#allocation19_spill]] %s2966_s25  ;;  %p3098_p0 = scmp.ge.s32.totalorder %s37_s28, 2 }
  0x18   : > { %p75_p1 = scmp.ne.s32.totalorder %s2954_s22, %s2950_s21  ;;  %p76_p2 = scmp.eq.s32.totalorder %s2974_s27, 0 }
  0x19   : > { %p81_p3 = scmp.ne.s32.totalorder %s2950_s21, %s2946_s20  ;;  %s3733_s28 = smov (%p3098_p0, %s37_s28), 0 }
  0x1a   : > { %3696 = sst [smem:[#allocation20_spill]] %s3733_s28  ;;  %p77_p4 = por %p76_p2, %p75_p1 }
  0x1b   : > { %s65_s12 = ssub.s32 %s2966_s25, %s3733_s28  ;;  %p2651_p5 = scmp.lt.s32.totalorder %s2974_s27, 6 }
  0x1c   : > { %p66_p6 = scmp.eq.s32.totalorder %s65_s12, 0  ;;  %s3117_s13 = sand.u32 1, %s2954_s22  }
  0x1d   : > { %p3122_p7 = pnand %p2651_p5, %p77_p4  ;;  %s387_s12 = sand.u32 1, %s2974_s27  }
  0x1e   : > { %s3127_s16 = scalar_select %p66_p6, %s2954_s22, %s68_s29  }
  0x1f   : > { %s2126_s28 = sshll.u32 %s3117_s13, 2  ;;  %s2127_s11 = sshll.u32 %s2966_s25, 2 }
  0x20   : > { %3698 = sst [smem:[#allocation21_spill]] %s3127_s16  ;;  %s391_s0 = scalar_lea.vmem [#allocation8], %s2126_s28 }
  0x21   : > { %s3699_s2 = sld [smem:[#allocation23_spill]]  ;;  %s399_s3 = sshll.u32 %s391_s0, 4  ;;  %s400_s3 = int_to_ptr.vmem [resolvable:$true] %s399_s3 }
  0x22   : > { %s3135_s7 = scalar_lea.sflag [#allocation9], %s387_s12  ;;  %s3679_s29 = sadd.s32 4294967295, %s2974_s27  }
  0x23   : > { %p3143_p8 = scmp.eq.s32.totalorder %s3679_s29, 0  ;;  %p206_p9 = scmp.ne.s32.totalorder %s2938_s18, %s2934_s17 }
  0x24   : > { %p2119_p10 = scmp.ge.s32.totalorder %s2974_s27, 1  ;;  %p327_p11 = scmp.lt.s32.totalorder %s2974_s27, 7 }
  0x25   : > { %p3156_p12 = por %p3143_p8, %p81_p3  ;;  %p3162_p13 = por %p206_p9, %p3143_p8 }
  0x26   : > { %p3166_p1 = pnand %p2119_p10, %p327_p11  ;;  %s3704_s10 = sld [smem:[#allocation30_spill]] }
  0x27   : > { %s395_s14 = scalar_lea.hbm %s3699_s2, %s2127_s11  ;;  %s2976_s20 = smov [#allocation11]  }
  0x28   : > { %s397_s23 = sshll.u32 %s395_s14, 4  ;;  %p2636_p3 = pneg %p3166_p1  ;;  %s398_s23 = int_to_ptr.hbm [resolvable:$true] %s397_s23 }
  0x29   : > { %2646 = dma.hbm_to_vmem [thread:$0]  (!%p3122_p7), %s398_s23, 64, %s400_s3, %s3135_s7  }
  0x2a   : > { %s353_s23 = sshll.u32 %s2976_s20, 4  ;;  %p2637_p4 = pnand %p2636_p3, %p3143_p8  ;;  %s354_s23 = int_to_ptr.vmem [resolvable:$true] %s353_s23 }
  0x2b   : > { %s2485_s28 = sshll.u32 %s2966_s25, 7  ;;  %s3705_s29 = sshll.u32 %s3117_s13, 7 }
  0x2c   : > { %s351_s17 = sshll.u32 %s3704_s10, 4  ;;  %s374_s9 = scalar_lea.hbm %s3664_s1, %s2485_s28  ;;  %s352_s17 = int_to_ptr.hbm [resolvable:$true] %s351_s17 }
  0x2d   : > { %2639 = dma.hbm_to_vmem [thread:$0]  (!%p2637_p4), %s352_s17, 16, %s354_s23, [#allocation12]  }
  0x2e   : > { %s375_s11 = sshll.u32 %s374_s9, 4  ;;  %s368_s2 = scalar_lea.vmem [#allocation6], %s3705_s29  ;;  %s376_s11 = int_to_ptr.hbm [resolvable:$true] %s375_s11 }
  0x2f   : > { %s377_s20 = sshll.u32 %s368_s2, 4  ;;  %s365_s10 = scalar_lea.sflag [#allocation7], %s3117_s13  ;;  %s378_s20 = int_to_ptr.vmem [resolvable:$true] %s377_s20 }
  0x30   : > { %s2977_s22 = smov 128   ;;  %s2978_s5 = smov 8  }
  0x31   : > { %2643 = dma.hbm_to_vmem [thread:$0]  (!%p3122_p7), %s376_s11, 2048, %s378_s20, %s365_s10, %s2977_s22, %s2977_s22, %s2978_s5  }
  0x32   : > { %s40_s25 = sadd.s32 1, %s2970_s26  ;;  %s193_s4 = sadd.s32 1, %s2942_s19 }
  0x33   : > { %s3735_s25 = smov (!%p3098_p0, %s40_s25), %s2970_s26  ;;  %p200_p6 = scmp.ne.s32.totalorder %s2942_s19, %s2938_s18 }
  0x34   : > { %s424_s17 = sand.u32 1, %s2942_s19   ;;  %p42_p9 = scmp.ge.s32.totalorder %s3735_s25, 3 }
  0x35   : > { %s2128_s2 = sshll.u32 %s424_s17, 2  ;;  %p202_p10 = por %p200_p6, %p76_p2 }
  0x36   : > { %s3737_s25 = smov (%p42_p9, %s3735_s25), 0  ;;  %s2129_s13 = sshll.u32 %s2970_s26, 2 }
  0x37   : > { %s426_s29 = scalar_lea.vmem [#allocation10], %s2128_s2  ;;  %s190_s5 = ssub.s32 %s2970_s26, %s3737_s25 }
  0x38   : > { %s434_s15 = sshll.u32 %s426_s29, 4  ;;  %s430_s30 = scalar_lea.hbm %s3669_s6, %s2129_s13  ;;  %s435_s15 = int_to_ptr.vmem [resolvable:$true] %s434_s15 }
  0x39   : > { %p191_p0 = scmp.eq.s32.totalorder %s190_s5, 0  ;;  %s432_s23 = sshll.u32 %s430_s30, 4  ;;  %s433_s23 = int_to_ptr.hbm [resolvable:$true] %s432_s23 }
  0x3a   : > { %p2647_p7 = pnand %p2651_p5, %p202_p10  ;;  %451 = sbr.rel (%p3166_p1) target bundleno = 1666 (0x682), region = 64 }
  0x3b   : > { %s3205_s28 = scalar_select %p191_p0, %s2942_s19, %s193_s4  }
  0x3c   : > { %2649 = dma.hbm_to_vmem [thread:$0]  (!%p2647_p7), %s433_s23, 64, %s435_s15, %s3135_s7  }
  0x3d   : > { %s453_s14 = sand.u32 (!%p3166_p1), 1, %s2950_s21  }
  0x3e   : > { %s2131_s12 = sshll.u32 (!%p3166_p1), %s453_s14, 7  ;;  %s454_s9 = scalar_lea.sflag (!%p3166_p1), [#allocation7], %s453_s14 }
  0x3f   : > { %s3213_s11 = scalar_lea.vmem [#allocation6], %s2131_s12 }
  0x40   : > { %2917 = dma.done.wait (%p3156_p12), %s454_s9, 2048  }
  0x41   : > { %2919 = vsyncadd (%p3156_p12), %s454_s9, 4294965248  ;;  %s3706_s4 = sadd.s32 4294967295, %s2974_s27   ;;  %s2132_s7 = sshll.u32 %s453_s14, 2 }
  0x42   : > { %s463_s20 = sand.u32 1, %s3706_s4   ;;  %s3221_s8 = scalar_lea.vmem [#allocation8], %s2132_s7 }
  0x43   : > { %s464_s17 = scalar_lea.sflag [#allocation9], %s463_s20 }
  0x44   : > { %2921 = dma.done.wait (%p3156_p12), %s464_s17, 64  }
  0x45   : > { %2923 = vsyncadd (%p3156_p12), %s464_s17, 4294967232  ;;  %s475_s2 = sand.u32 1, %s2938_s18  }
  0x46   : > { %s3228_s13 = sshll.u32 %s475_s2, 2 }
  0x47   : > { %s477_s29 = scalar_lea.vmem [#allocation10], %s3228_s13 }
  0x48   : > { %2925 = dma.done.wait (%p3162_p13), %s464_s17, 64  }
  0x49   : > { %2927 = vsyncadd (%p3162_p13), %s464_s17, 4294967232 }
  0x4a   : > { %2929 = dma.done.wait (%p3143_p8), [#allocation12], 16  }
  0x4b   : > { %2931 = vsyncadd (%p3143_p8), [#allocation12], 4294967280  ;;  %p543_p2 = scmp.lt.s32.totalorder %s2962_s24, 2  ;;  %s3707_s22 = sld [smem:[#allocation25_spill]] }
  0x4c   : > { %s3708_s3 = sld [smem:[#allocation26_spill]] }
  0x4d   : > { %s544_s0 = scalar_select %p543_p2, %s2962_s24, 2 }
  0x4e   : > { %s3709_s20 = sld [smem:[#allocation27_spill]] }
  0x4f   : > { %s2486_s15 = sshll.u32 %s544_s0, 4  ;;  %s3710_s7 = sld [smem:[#allocation18_spill]] }
  0x51   : > { %s3244_s30 = scalar_lea.vmem %s3707_s22, %s2486_s15 }
  0x52   : > { %s3249_s12 = scalar_lea.vmem %s3708_s3, %s2486_s15 }
  0x54   : > { %s3254_s16 = scalar_lea.vmem %s3709_s20, %s2486_s15 }
  0x55   : > { %p2141_p5 = scmp.ne.s32.totalorder %s3710_s7, 0 }
  0x56   : > { %p2142_p8 = scmp.ne.s32.totalorder (!%p2141_p5), %s2962_s24, 0 }
  0x57   : > { %562 = sbr.rel (%p2141_p5) target bundleno = 503 (0x1f7), region = 84 }
  0x5c   : > { %vm563_vm0 = vcmask 261120   ;;  %v2979_v0 = vmov 0.0   ;;  %568 = sbr.rel (%p2142_p8) target bundleno = 295 (0x127), region = 88  ;;  %s3711_s0 = sld [smem:[#allocation24_spill]] (!%p2142_p8) }
  0x5d   : > { %564 = vst.msk [vmem:[#allocation4] sm:$0xff] %vm563_vm0, %v2979_v0  ;;  %s3712_s10 = sld [smem:[#allocation22_spill]] (!%p2142_p8) }
  0x61   : > { %v2980_v2 = vmov 0.0   ;;  %vm690_vm1 = vcmask 130048   ;;  %vm860_vm2 = vcmask 257024  }
  0x62   : > { %v2505_v1 = vld [vmem:[%s3711_s0] sm:$0xff]  ;;  %569 = vst.msk [vmem:[#allocation5] sm:$0xff] %vm563_vm0, %v2980_v2 }
  0x63   : > { %v2489_v3 = vld [vmem:[%s3712_s10] sm:$0xff]  ;;  %746 = vmatpush.bf16.msra.mxu0 %v2505_v1  ;;  %2601 = vmatpush.bf16.msra.mxu1 %v2505_v1  ;;  %v2490_v7 = vld [vmem:[%s3712_s10 + $0x8] sm:$0xff]  ;;  %v2491_v11 = vld [vmem:[%s3712_s10 + $0x10] sm:$0xff] }
  0x64   : > { %v2493_v4 = vld [vmem:[%s3712_s10 + $0x20] sm:$0xff]  ;;  %2602 = vmatpush.bf16.msra.mxu2 %v2505_v1  ;;  %2603 = vmatpush.bf16.msra.mxu3 %v2505_v1  ;;  %v2494_v8 = vld [vmem:[%s3712_s10 + $0x28] sm:$0xff]  ;;  %v2495_v12 = vld [vmem:[%s3712_s10 + $0x30] sm:$0xff] }
  0x65   : > { %v2497_v5 = vld [vmem:[%s3712_s10 + $0x40] sm:$0xff]  ;;  %v2498_v9 = vld [vmem:[%s3712_s10 + $0x48] sm:$0xff]  ;;  %v2499_v13 = vld [vmem:[%s3712_s10 + $0x50] sm:$0xff] }
  0x66   : > { %v2501_v6 = vld [vmem:[%s3712_s10 + $0x60] sm:$0xff]  ;;  %2211 = vmatmul.msk.bf16.vlgmr.msra.gmra.mxu0 %vm690_vm1, %v2489_v3  ;;  %2215 = vmatmul.msk.bf16.vlgmr.msra.gmra.mxu1 %vm690_vm1, %v2493_v4  ;;  %v2502_v10 = vld [vmem:[%s3712_s10 + $0x68] sm:$0xff]  ;;  %v2503_v14 = vld [vmem:[%s3712_s10 + $0x70] sm:$0xff] }
  0x67   : > { %2219 = vmatmul.msk.bf16.vlgmr.msra.gmra.mxu2 %vm690_vm1, %v2497_v5  ;;  %2223 = vmatmul.msk.bf16.vlgmr.msra.gmra.mxu3 %vm690_vm1, %v2501_v6  ;;  %v2492_v15 = vld [vmem:[%s3712_s10 + $0x18] sm:$0xff] }
  0x68   : > { %v2496_v16 = vld [vmem:[%s3712_s10 + $0x38] sm:$0xff] }
  0x69   : > { %v2500_v17 = vld [vmem:[%s3712_s10 + $0x58] sm:$0xff] }
  0x6a   : > { %v2504_v18 = vld [vmem:[%s3712_s10 + $0x78] sm:$0xff] }
  0x76   : > { %2212 = vmatmul.msk.bf16.gmra.mxu0 %vm690_vm1, %v2490_v7  ;;  %2216 = vmatmul.msk.bf16.gmra.mxu1 %vm690_vm1, %v2494_v8 }
  0x77   : > { %2220 = vmatmul.msk.bf16.gmra.mxu2 %vm690_vm1, %v2498_v9  ;;  %2224 = vmatmul.msk.bf16.gmra.mxu3 %vm690_vm1, %v2502_v10 }
  0x86   : > { %2213 = vmatmul.msk.bf16.gmra.mxu0 %vm690_vm1, %v2491_v11  ;;  %2217 = vmatmul.msk.bf16.gmra.mxu1 %vm690_vm1, %v2495_v12 }
  0x87   : > { %2221 = vmatmul.msk.bf16.gmra.mxu2 %vm690_vm1, %v2499_v13  ;;  %2225 = vmatmul.msk.bf16.gmra.mxu3 %vm690_vm1, %v2503_v14 }
  0x96   : > { %2214 = vmatmul.msk.bf16.gmra.mxu0 %vm690_vm1, %v2492_v15  ;;  %2218 = vmatmul.msk.bf16.gmra.mxu1 %vm690_vm1, %v2496_v16 }
  0x97   : > { %2222 = vmatmul.msk.bf16.gmra.mxu2 %vm690_vm1, %v2500_v17  ;;  %2226 = vmatmul.msk.bf16.gmra.mxu3 %vm690_vm1, %v2504_v18 }
  0xe3   : > { %v748_v19 = vpop.f32.mrf.mxu0  ;;  %v768_v20 = vpop.f32.mrf.mxu1 }
  0xe4   : > { %v828_v21 = vpack.c.bf16 %v748_v19, %v748_v19  ;;  %v836_v22 = vpack.c.bf16 %v768_v20, %v768_v20 }
  0xe6   : > { %861 = vst.msk [vmem:[#allocation2] sm:$0xf] %vm860_vm2, %v828_v21 }
  0xe7   : > { %869 = vst.msk [vmem:[#allocation2 + $0x20] sm:$0xf] %vm860_vm2, %v836_v22 }
  0xea   : > { %v788_v23 = vpop.f32.mrf.mxu2  ;;  %v808_v24 = vpop.f32.mrf.mxu3 }
  0xeb   : > { %v844_v25 = vpack.c.bf16 %v788_v23, %v788_v23  ;;  %v852_v26 = vpack.c.bf16 %v808_v24, %v808_v24  ;;  %v750_v27 = vpop.f32.mrf.mxu0  ;;  %v770_v28 = vpop.f32.mrf.mxu1 }
  0xec   : > { %v829_v29 = vpack.c.bf16 %v750_v27, %v750_v27  ;;  %v837_v30 = vpack.c.bf16 %v770_v28, %v770_v28 }
  0xed   : > { %877 = vst.msk [vmem:[#allocation2 + $0x40] sm:$0xf] %vm860_vm2, %v844_v25 }
  0xee   : > { %885 = vst.msk [vmem:[#allocation2 + $0x60] sm:$0xf] %vm860_vm2, %v852_v26 }
  0xef   : > { %862 = vst.msk [vmem:[#allocation2 + $0x4] sm:$0xf] %vm860_vm2, %v829_v29 }
  0xf0   : > { %870 = vst.msk [vmem:[#allocation2 + $0x24] sm:$0xf] %vm860_vm2, %v837_v30 }
  0xf2   : > { %v790_v31 = vpop.f32.mrf.mxu2  ;;  %v810_v32 = vpop.f32.mrf.mxu3 }
  0xf3   : > { %v845_v33 = vpack.c.bf16 %v790_v31, %v790_v31  ;;  %v853_v34 = vpack.c.bf16 %v810_v32, %v810_v32  ;;  %v753_v35 = vpop.f32.mrf.mxu0  ;;  %v773_v36 = vpop.f32.mrf.mxu1 }
  0xf4   : > { %v830_v37 = vpack.c.bf16 %v753_v35, %v753_v35  ;;  %v838_v38 = vpack.c.bf16 %v773_v36, %v773_v36 }
  0xf5   : > { %878 = vst.msk [vmem:[#allocation2 + $0x44] sm:$0xf] %vm860_vm2, %v845_v33 }
  0xf6   : > { %886 = vst.msk [vmem:[#allocation2 + $0x64] sm:$0xf] %vm860_vm2, %v853_v34 }
  0xf7   : > { %863 = vst.msk [vmem:[#allocation2 + $0x8] sm:$0xf] %vm860_vm2, %v830_v37 }
  0xf8   : > { %871 = vst.msk [vmem:[#allocation2 + $0x28] sm:$0xf] %vm860_vm2, %v838_v38 }
  0xfa   : > { %v793_v39 = vpop.f32.mrf.mxu2  ;;  %v813_v40 = vpop.f32.mrf.mxu3 }
  0xfb   : > { %v846_v41 = vpack.c.bf16 %v793_v39, %v793_v39  ;;  %v854_v42 = vpack.c.bf16 %v813_v40, %v813_v40  ;;  %v755_v43 = vpop.f32.mrf.mxu0  ;;  %v775_v44 = vpop.f32.mrf.mxu1 }
  0xfc   : > { %v831_v45 = vpack.c.bf16 %v755_v43, %v755_v43  ;;  %v839_v46 = vpack.c.bf16 %v775_v44, %v775_v44 }
  0xfd   : > { %879 = vst.msk [vmem:[#allocation2 + $0x48] sm:$0xf] %vm860_vm2, %v846_v41 }
  0xfe   : > { %887 = vst.msk [vmem:[#allocation2 + $0x68] sm:$0xf] %vm860_vm2, %v854_v42 }
  0xff   : > { %864 = vst.msk [vmem:[#allocation2 + $0xc] sm:$0xf] %vm860_vm2, %v831_v45 }
 0x100   : > { %872 = vst.msk [vmem:[#allocation2 + $0x2c] sm:$0xf] %vm860_vm2, %v839_v46 }
 0x102   : > { %v795_v47 = vpop.f32.mrf.mxu2  ;;  %v815_v48 = vpop.f32.mrf.mxu3 }
 0x103   : > { %v847_v49 = vpack.c.bf16 %v795_v47, %v795_v47  ;;  %v855_v50 = vpack.c.bf16 %v815_v48, %v815_v48  ;;  %v758_v51 = vpop.f32.mrf.mxu0  ;;  %v778_v52 = vpop.f32.mrf.mxu1 }
 0x104   : > { %v832_v53 = vpack.c.bf16 %v758_v51, %v758_v51  ;;  %v840_v54 = vpack.c.bf16 %v778_v52, %v778_v52 }
 0x105   : > { %880 = vst.msk [vmem:[#allocation2 + $0x4c] sm:$0xf] %vm860_vm2, %v847_v49 }
 0x106   : > { %888 = vst.msk [vmem:[#allocation2 + $0x6c] sm:$0xf] %vm860_vm2, %v855_v50 }
 0x107   : > { %865 = vst.msk [vmem:[#allocation2 + $0x10] sm:$0xf] %vm860_vm2, %v832_v53 }
 0x108   : > { %873 = vst.msk [vmem:[#allocation2 + $0x30] sm:$0xf] %vm860_vm2, %v840_v54 }
 0x10a   : > { %v798_v55 = vpop.f32.mrf.mxu2  ;;  %v818_v56 = vpop.f32.mrf.mxu3 }
 0x10b   : > { %v848_v57 = vpack.c.bf16 %v798_v55, %v798_v55  ;;  %v856_v58 = vpack.c.bf16 %v818_v56, %v818_v56  ;;  %v760_v59 = vpop.f32.mrf.mxu0  ;;  %v780_v60 = vpop.f32.mrf.mxu1 }
 0x10c   : > { %v833_v61 = vpack.c.bf16 %v760_v59, %v760_v59  ;;  %v841_v62 = vpack.c.bf16 %v780_v60, %v780_v60 }
 0x10d   : > { %881 = vst.msk [vmem:[#allocation2 + $0x50] sm:$0xf] %vm860_vm2, %v848_v57 }
 0x10e   : > { %889 = vst.msk [vmem:[#allocation2 + $0x70] sm:$0xf] %vm860_vm2, %v856_v58 }
 0x10f   : > { %866 = vst.msk [vmem:[#allocation2 + $0x14] sm:$0xf] %vm860_vm2, %v833_v61 }
 0x110   : > { %874 = vst.msk [vmem:[#allocation2 + $0x34] sm:$0xf] %vm860_vm2, %v841_v62 }
 0x112   : > { %v800_v63 = vpop.f32.mrf.mxu2  ;;  %v820_v0 = vpop.f32.mrf.mxu3 }
 0x113   : > { %v849_v1 = vpack.c.bf16 %v800_v63, %v800_v63  ;;  %v857_v2 = vpack.c.bf16 %v820_v0, %v820_v0  ;;  %v763_v3 = vpop.f32.mrf.mxu0  ;;  %v783_v4 = vpop.f32.mrf.mxu1 }
 0x114   : > { %v834_v5 = vpack.c.bf16 %v763_v3, %v763_v3  ;;  %v842_v6 = vpack.c.bf16 %v783_v4, %v783_v4 }
 0x115   : > { %882 = vst.msk [vmem:[#allocation2 + $0x54] sm:$0xf] %vm860_vm2, %v849_v1 }
 0x116   : > { %890 = vst.msk [vmem:[#allocation2 + $0x74] sm:$0xf] %vm860_vm2, %v857_v2 }
 0x117   : > { %867 = vst.msk [vmem:[#allocation2 + $0x18] sm:$0xf] %vm860_vm2, %v834_v5 }
 0x118   : > { %875 = vst.msk [vmem:[#allocation2 + $0x38] sm:$0xf] %vm860_vm2, %v842_v6 }
 0x11a   : > { %v803_v7 = vpop.f32.mrf.mxu2  ;;  %v823_v8 = vpop.f32.mrf.mxu3 }
 0x11b   : > { %v850_v9 = vpack.c.bf16 %v803_v7, %v803_v7  ;;  %v858_v10 = vpack.c.bf16 %v823_v8, %v823_v8  ;;  %v765_v11 = vpop.f32.mrf.mxu0  ;;  %v785_v12 = vpop.f32.mrf.mxu1 }
 0x11c   : > { %v835_v13 = vpack.c.bf16 %v765_v11, %v765_v11  ;;  %v843_v14 = vpack.c.bf16 %v785_v12, %v785_v12 }
 0x11d   : > { %883 = vst.msk [vmem:[#allocation2 + $0x58] sm:$0xf] %vm860_vm2, %v850_v9 }
 0x11e   : > { %891 = vst.msk [vmem:[#allocation2 + $0x78] sm:$0xf] %vm860_vm2, %v858_v10 }
 0x11f   : > { %868 = vst.msk [vmem:[#allocation2 + $0x1c] sm:$0xf] %vm860_vm2, %v835_v13 }
 0x120   : > { %876 = vst.msk [vmem:[#allocation2 + $0x3c] sm:$0xf] %vm860_vm2, %v843_v14 }
 0x122   : > { %v805_v15 = vpop.f32.mrf.mxu2  ;;  %v825_v16 = vpop.f32.mrf.mxu3 }
 0x123   : > { %v851_v17 = vpack.c.bf16 %v805_v15, %v805_v15  ;;  %v859_v18 = vpack.c.bf16 %v825_v16, %v825_v16 }
 0x125   : > { %884 = vst.msk [vmem:[#allocation2 + $0x5c] sm:$0xf] %vm860_vm2, %v851_v17 }
 0x126   : > { %892 = vst.msk [vmem:[#allocation2 + $0x7c] sm:$0xf] %vm860_vm2, %v859_v18 }
 0x127 PF: > { %p2227_p11 = scmp.le.s32.totalorder %s2962_s24, 0 }
 0x129   : > { %896 = sbr.rel (%p2227_p11) target bundleno = 503 (0x1f7), region = 92 }
 0x12e   : > { %v2523_v19 = vld [vmem:[%s3244_s30 + $0x8] sm:$0xff]  ;;  %v2522_v20 = vld [vmem:[%s3244_s30] sm:$0xff]  ;;  %v2508_v29 = vld [vmem:[#allocation3 + $0x10] sm:$0xff]  ;;  %vm1194_vm3 = vcmask 257024  }
 0x12f   : > { %1079 = vmatpush.bf16.msra.mxu0 %v2523_v19  ;;  %2604 = vmatpush.bf16.msra.mxu1 %v2523_v19  ;;  %v2506_v21 = vld [vmem:[#allocation3] sm:$0xff]  ;;  %v2507_v25 = vld [vmem:[#allocation3 + $0x8] sm:$0xff]  ;;  %v2512_v30 = vld [vmem:[#allocation3 + $0x30] sm:$0xff] }
 0x130   : > { %2605 = vmatpush.bf16.msra.mxu2 %v2523_v19  ;;  %2606 = vmatpush.bf16.msra.mxu3 %v2523_v19  ;;  %v2510_v22 = vld [vmem:[#allocation3 + $0x20] sm:$0xff]  ;;  %v2511_v26 = vld [vmem:[#allocation3 + $0x28] sm:$0xff]  ;;  %v2516_v31 = vld [vmem:[#allocation3 + $0x50] sm:$0xff] }
 0x131   : > { %v2514_v23 = vld [vmem:[#allocation3 + $0x40] sm:$0xff]  ;;  %v2515_v27 = vld [vmem:[#allocation3 + $0x48] sm:$0xff]  ;;  %v2520_v32 = vld [vmem:[#allocation3 + $0x70] sm:$0xff] }
 0x132   : > { %v2518_v24 = vld [vmem:[#allocation3 + $0x60] sm:$0xff]  ;;  %v2519_v28 = vld [vmem:[#allocation3 + $0x68] sm:$0xff]  ;;  %v2509_v33 = vld [vmem:[#allocation3 + $0x18] sm:$0xff] }
 0x133   : > { %1080 = vmatpush.bf16.msra.mxu0 %v2522_v20  ;;  %2607 = vmatpush.bf16.msra.mxu1 %v2522_v20  ;;  %v2513_v34 = vld [vmem:[#allocation3 + $0x38] sm:$0xff] }
 0x134   : > { %2608 = vmatpush.bf16.msra.mxu2 %v2522_v20  ;;  %2609 = vmatpush.bf16.msra.mxu3 %v2522_v20  ;;  %v2517_v35 = vld [vmem:[#allocation3 + $0x58] sm:$0xff] }
 0x135   : > { %v2521_v36 = vld [vmem:[#allocation3 + $0x78] sm:$0xff] }
 0x136   : > { %2300 = vmatmul.msk.bf16.vlgmr.msra.gmra.mxu0 %vm563_vm0, %v2506_v21  ;;  %2304 = vmatmul.msk.bf16.vlgmr.msra.gmra.mxu1 %vm563_vm0, %v2510_v22 }
 0x137   : > { %2308 = vmatmul.msk.bf16.vlgmr.msra.gmra.mxu2 %vm563_vm0, %v2514_v23  ;;  %2312 = vmatmul.msk.bf16.vlgmr.msra.gmra.mxu3 %vm563_vm0, %v2518_v24 }
 0x146   : > { %2301 = vmatmul.msk.bf16.gmra.mxu0 %vm563_vm0, %v2507_v25  ;;  %2305 = vmatmul.msk.bf16.gmra.mxu1 %vm563_vm0, %v2511_v26 }
 0x147   : > { %2309 = vmatmul.msk.bf16.gmra.mxu2 %vm563_vm0, %v2515_v27  ;;  %2313 = vmatmul.msk.bf16.gmra.mxu3 %vm563_vm0, %v2519_v28 }
 0x156   : > { %2302 = vmatmul.msk.bf16.gmra.mxu0 %vm563_vm0, %v2508_v29  ;;  %2306 = vmatmul.msk.bf16.gmra.mxu1 %vm563_vm0, %v2512_v30 }
 0x157   : > { %2310 = vmatmul.msk.bf16.gmra.mxu2 %vm563_vm0, %v2516_v31  ;;  %2314 = vmatmul.msk.bf16.gmra.mxu3 %vm563_vm0, %v2520_v32 }
 0x166   : > { %2303 = vmatmul.msk.bf16.gmra.mxu0 %vm563_vm0, %v2509_v33  ;;  %2307 = vmatmul.msk.bf16.gmra.mxu1 %vm563_vm0, %v2513_v34 }
 0x167   : > { %2311 = vmatmul.msk.bf16.gmra.mxu2 %vm563_vm0, %v2517_v35  ;;  %2315 = vmatmul.msk.bf16.gmra.mxu3 %vm563_vm0, %v2521_v36 }
 0x1b3   : > { %v1082_v37 = vpop.f32.mrf.mxu0  ;;  %v1102_v38 = vpop.f32.mrf.mxu1 }
 0x1b4   : > { %v1162_v39 = vpack.c.bf16 %v1082_v37, %v1082_v37  ;;  %v1170_v40 = vpack.c.bf16 %v1102_v38, %v1102_v38 }
 0x1b6   : > { %1195 = vst.msk [vmem:[#allocation2] sm:$0xf] %vm1194_vm3, %v1162_v39 }
 0x1b7   : > { %1203 = vst.msk [vmem:[#allocation2 + $0x20] sm:$0xf] %vm1194_vm3, %v1170_v40 }
 0x1ba   : > { %v1122_v41 = vpop.f32.mrf.mxu2  ;;  %v1142_v42 = vpop.f32.mrf.mxu3 }
 0x1bb   : > { %v1178_v43 = vpack.c.bf16 %v1122_v41, %v1122_v41  ;;  %v1186_v44 = vpack.c.bf16 %v1142_v42, %v1142_v42  ;;  %v1084_v45 = vpop.f32.mrf.mxu0  ;;  %v1104_v46 = vpop.f32.mrf.mxu1 }
 0x1bc   : > { %v1163_v47 = vpack.c.bf16 %v1084_v45, %v1084_v45  ;;  %v1171_v48 = vpack.c.bf16 %v1104_v46, %v1104_v46 }
 0x1bd   : > { %1211 = vst.msk [vmem:[#allocation2 + $0x40] sm:$0xf] %vm1194_vm3, %v1178_v43 }
 0x1be   : > { %1219 = vst.msk [vmem:[#allocation2 + $0x60] sm:$0xf] %vm1194_vm3, %v1186_v44 }
 0x1bf   : > { %1196 = vst.msk [vmem:[#allocation2 + $0x4] sm:$0xf] %vm1194_vm3, %v1163_v47 }
 0x1c0   : > { %1204 = vst.msk [vmem:[#allocation2 + $0x24] sm:$0xf] %vm1194_vm3, %v1171_v48 }
 0x1c2   : > { %v1124_v49 = vpop.f32.mrf.mxu2  ;;  %v1144_v50 = vpop.f32.mrf.mxu3 }
 0x1c3   : > { %v1179_v51 = vpack.c.bf16 %v1124_v49, %v1124_v49  ;;  %v1187_v52 = vpack.c.bf16 %v1144_v50, %v1144_v50  ;;  %v1087_v53 = vpop.f32.mrf.mxu0  ;;  %v1107_v54 = vpop.f32.mrf.mxu1 }
 0x1c4   : > { %v1164_v55 = vpack.c.bf16 %v1087_v53, %v1087_v53  ;;  %v1172_v56 = vpack.c.bf16 %v1107_v54, %v1107_v54 }
 0x1c5   : > { %1212 = vst.msk [vmem:[#allocation2 + $0x44] sm:$0xf] %vm1194_vm3, %v1179_v51 }
 0x1c6   : > { %1220 = vst.msk [vmem:[#allocation2 + $0x64] sm:$0xf] %vm1194_vm3, %v1187_v52 }
 0x1c7   : > { %1197 = vst.msk [vmem:[#allocation2 + $0x8] sm:$0xf] %vm1194_vm3, %v1164_v55 }
 0x1c8   : > { %1205 = vst.msk [vmem:[#allocation2 + $0x28] sm:$0xf] %vm1194_vm3, %v1172_v56 }
 0x1ca   : > { %v1127_v57 = vpop.f32.mrf.mxu2  ;;  %v1147_v58 = vpop.f32.mrf.mxu3 }
 0x1cb   : > { %v1180_v59 = vpack.c.bf16 %v1127_v57, %v1127_v57  ;;  %v1188_v60 = vpack.c.bf16 %v1147_v58, %v1147_v58  ;;  %v1089_v61 = vpop.f32.mrf.mxu0  ;;  %v1109_v62 = vpop.f32.mrf.mxu1 }
 0x1cc   : > { %v1165_v63 = vpack.c.bf16 %v1089_v61, %v1089_v61  ;;  %v1173_v0 = vpack.c.bf16 %v1109_v62, %v1109_v62 }
 0x1cd   : > { %1213 = vst.msk [vmem:[#allocation2 + $0x48] sm:$0xf] %vm1194_vm3, %v1180_v59 }
 0x1ce   : > { %1221 = vst.msk [vmem:[#allocation2 + $0x68] sm:$0xf] %vm1194_vm3, %v1188_v60 }
 0x1cf   : > { %1198 = vst.msk [vmem:[#allocation2 + $0xc] sm:$0xf] %vm1194_vm3, %v1165_v63 }
 0x1d0   : > { %1206 = vst.msk [vmem:[#allocation2 + $0x2c] sm:$0xf] %vm1194_vm3, %v1173_v0 }
 0x1d2   : > { %v1129_v1 = vpop.f32.mrf.mxu2  ;;  %v1149_v2 = vpop.f32.mrf.mxu3 }
 0x1d3   : > { %v1181_v3 = vpack.c.bf16 %v1129_v1, %v1129_v1  ;;  %v1189_v4 = vpack.c.bf16 %v1149_v2, %v1149_v2  ;;  %v1092_v5 = vpop.f32.mrf.mxu0  ;;  %v1112_v6 = vpop.f32.mrf.mxu1 }
 0x1d4   : > { %v1166_v7 = vpack.c.bf16 %v1092_v5, %v1092_v5  ;;  %v1174_v8 = vpack.c.bf16 %v1112_v6, %v1112_v6 }
 0x1d5   : > { %1214 = vst.msk [vmem:[#allocation2 + $0x4c] sm:$0xf] %vm1194_vm3, %v1181_v3 }
 0x1d6   : > { %1222 = vst.msk [vmem:[#allocation2 + $0x6c] sm:$0xf] %vm1194_vm3, %v1189_v4 }
 0x1d7   : > { %1199 = vst.msk [vmem:[#allocation2 + $0x10] sm:$0xf] %vm1194_vm3, %v1166_v7 }
 0x1d8   : > { %1207 = vst.msk [vmem:[#allocation2 + $0x30] sm:$0xf] %vm1194_vm3, %v1174_v8 }
 0x1da   : > { %v1132_v9 = vpop.f32.mrf.mxu2  ;;  %v1152_v10 = vpop.f32.mrf.mxu3 }
 0x1db   : > { %v1182_v11 = vpack.c.bf16 %v1132_v9, %v1132_v9  ;;  %v1190_v12 = vpack.c.bf16 %v1152_v10, %v1152_v10  ;;  %v1094_v13 = vpop.f32.mrf.mxu0  ;;  %v1114_v14 = vpop.f32.mrf.mxu1 }
 0x1dc   : > { %v1167_v15 = vpack.c.bf16 %v1094_v13, %v1094_v13  ;;  %v1175_v16 = vpack.c.bf16 %v1114_v14, %v1114_v14 }
 0x1dd   : > { %1215 = vst.msk [vmem:[#allocation2 + $0x50] sm:$0xf] %vm1194_vm3, %v1182_v11 }
 0x1de   : > { %1223 = vst.msk [vmem:[#allocation2 + $0x70] sm:$0xf] %vm1194_vm3, %v1190_v12 }
 0x1df   : > { %1200 = vst.msk [vmem:[#allocation2 + $0x14] sm:$0xf] %vm1194_vm3, %v1167_v15 }
 0x1e0   : > { %1208 = vst.msk [vmem:[#allocation2 + $0x34] sm:$0xf] %vm1194_vm3, %v1175_v16 }
 0x1e2   : > { %v1134_v17 = vpop.f32.mrf.mxu2  ;;  %v1154_v18 = vpop.f32.mrf.mxu3 }
 0x1e3   : > { %v1183_v19 = vpack.c.bf16 %v1134_v17, %v1134_v17  ;;  %v1191_v20 = vpack.c.bf16 %v1154_v18, %v1154_v18  ;;  %v1097_v21 = vpop.f32.mrf.mxu0  ;;  %v1117_v22 = vpop.f32.mrf.mxu1 }
 0x1e4   : > { %v1168_v23 = vpack.c.bf16 %v1097_v21, %v1097_v21  ;;  %v1176_v24 = vpack.c.bf16 %v1117_v22, %v1117_v22 }
 0x1e5   : > { %1216 = vst.msk [vmem:[#allocation2 + $0x54] sm:$0xf] %vm1194_vm3, %v1183_v19 }
 0x1e6   : > { %1224 = vst.msk [vmem:[#allocation2 + $0x74] sm:$0xf] %vm1194_vm3, %v1191_v20 }
 0x1e7   : > { %1201 = vst.msk [vmem:[#allocation2 + $0x18] sm:$0xf] %vm1194_vm3, %v1168_v23 }
 0x1e8   : > { %1209 = vst.msk [vmem:[#allocation2 + $0x38] sm:$0xf] %vm1194_vm3, %v1176_v24 }
 0x1ea   : > { %v1137_v25 = vpop.f32.mrf.mxu2  ;;  %v1157_v26 = vpop.f32.mrf.mxu3 }
 0x1eb   : > { %v1184_v27 = vpack.c.bf16 %v1137_v25, %v1137_v25  ;;  %v1192_v28 = vpack.c.bf16 %v1157_v26, %v1157_v26  ;;  %v1099_v29 = vpop.f32.mrf.mxu0  ;;  %v1119_v30 = vpop.f32.mrf.mxu1 }
 0x1ec   : > { %v1169_v31 = vpack.c.bf16 %v1099_v29, %v1099_v29  ;;  %v1177_v32 = vpack.c.bf16 %v1119_v30, %v1119_v30 }
 0x1ed   : > { %1217 = vst.msk [vmem:[#allocation2 + $0x58] sm:$0xf] %vm1194_vm3, %v1184_v27 }
 0x1ee   : > { %1225 = vst.msk [vmem:[#allocation2 + $0x78] sm:$0xf] %vm1194_vm3, %v1192_v28 }
 0x1ef   : > { %1202 = vst.msk [vmem:[#allocation2 + $0x1c] sm:$0xf] %vm1194_vm3, %v1169_v31 }
 0x1f0   : > { %1210 = vst.msk [vmem:[#allocation2 + $0x3c] sm:$0xf] %vm1194_vm3, %v1177_v32 }
 0x1f2   : > { %v1139_v33 = vpop.f32.mrf.mxu2  ;;  %v1159_v34 = vpop.f32.mrf.mxu3 }
 0x1f3   : > { %v1185_v35 = vpack.c.bf16 %v1139_v33, %v1139_v33  ;;  %v1193_v36 = vpack.c.bf16 %v1159_v34, %v1159_v34 }
 0x1f5   : > { %1218 = vst.msk [vmem:[#allocation2 + $0x5c] sm:$0xf] %vm1194_vm3, %v1185_v35 }
 0x1f6   : > { %1226 = vst.msk [vmem:[#allocation2 + $0x7c] sm:$0xf] %vm1194_vm3, %v1193_v36 }
 0x1f7 PF: > { %v2547_v37 = vld [vmem:[#allocation2 + $0x38] sm:$0xff]  ;;  %v2546_v39 = vld [vmem:[#allocation2 + $0x30] sm:$0xff]  ;;  %v2545_v41 = vld [vmem:[#allocation2 + $0x28] sm:$0xff]  ;;  %s3713_s30 = sld [smem:[#allocation18_spill]]  ;;  %vm1645_vm4 = vcmask 261120   ;;  %vm1787_vm5 = vcmask 257024  }
 0x1f8   : > { %1489 = vmatpush.bf16.msra.mxu0 %v2547_v37  ;;  %v2554_v40 = vld [vmem:[#allocation2 + $0x70] sm:$0xff]  ;;  %2610 = vmatpush.bf16.msra.mxu3 %v2547_v37  ;;  %v2553_v42 = vld [vmem:[#allocation2 + $0x68] sm:$0xff]  ;;  %v2544_v43 = vld [vmem:[#allocation2 + $0x20] sm:$0xff] }
 0x1f9   : > { %v2552_v44 = vld [vmem:[#allocation2 + $0x60] sm:$0xff]  ;;  %v2543_v45 = vld [vmem:[#allocation2 + $0x18] sm:$0xff]  ;;  %v2542_v47 = vld [vmem:[#allocation2 + $0x10] sm:$0xff] }
 0x1fa   : > { %v2550_v48 = vld [vmem:[#allocation2 + $0x50] sm:$0xff]  ;;  %v2541_v49 = vld [vmem:[#allocation2 + $0x8] sm:$0xff]  ;;  %v2540_v51 = vld [vmem:[#allocation2] sm:$0xff] }
 0x1fb   : > { %v2549_v50 = vld [vmem:[#allocation2 + $0x48] sm:$0xff]  ;;  %v2548_v52 = vld [vmem:[#allocation2 + $0x40] sm:$0xff]  ;;  %v2320_v53 = vld [vmem:[%s3213_s11] sm:$0xf] }
 0x1fc   : > { %1490 = vmatpush.bf16.msra.mxu0 %v2546_v39  ;;  %2611 = vmatpush.bf16.msra.mxu3 %v2546_v39  ;;  %v2551_v46 = vld [vmem:[#allocation2 + $0x58] sm:$0xff]  ;;  %v2524_v55 = vld [vmem:[%s3213_s11 + $0x4] sm:$0xf]  ;;  %v2368_v57 = vld [vmem:[%s3213_s11 + $0x60] sm:$0xf] }
 0x1fd   : > { %v2555_v38 = vld [vmem:[#allocation2 + $0x78] sm:$0xff]  ;;  %v2328_v62 = vld [vmem:[%s3213_s11 + $0x10] sm:$0xf]  ;;  %v2527_v63 = vld [vmem:[%s3213_s11 + $0x14] sm:$0xf0]  ;;  %s2316_s9 = sshll.u32 %s3713_s30, 7 }
 0x1fe   : > { %1538 = vmatpush.bf16.msra.mxu1 %v2555_v38  ;;  %v2525_v54 = vld [vmem:[%s3213_s11 + $0x4] sm:$0xf0]  ;;  %v2322_v56 = vld [vmem:[%s3213_s11 + $0x8] sm:$0xf0]  ;;  %v2526_v0 = vld [vmem:[%s3213_s11 + $0x14] sm:$0xf]  ;;  %v2329_v4 = vor.u32 %v2527_v63, %v2328_v62 }
 0x1ff   : > { %v2537_v58 = vld [vmem:[%s3213_s11 + $0x64] sm:$0xf0]  ;;  %v2321_v59 = vor.u32 %v2525_v54, %v2320_v53  ;;  %v2325_v60 = vor.u32 %v2524_v55, %v2322_v56  ;;  %v2330_v1 = vld [vmem:[%s3213_s11 + $0x18] sm:$0xf0]  ;;  %v2376_v2 = vld [vmem:[%s3213_s11 + $0x70] sm:$0xf] }
 0x200   : > { %1491 = vmatpush.bf16.msra.mxu0 %v2545_v41  ;;  %2612 = vmatpush.bf16.msra.mxu3 %v2545_v41  ;;  %v2369_v61 = vor.u32 %v2537_v58, %v2368_v57  ;;  %v2539_v3 = vld [vmem:[%s3213_s11 + $0x74] sm:$0xf0]  ;;  %v2333_v5 = vor.u32 %v2526_v0, %v2330_v1  ;;  %v2336_v7 = vld [vmem:[%s3213_s11 + $0x20] sm:$0xf]  ;;  %v2529_v8 = vld [vmem:[%s3213_s11 + $0x24] sm:$0xf0] }
 0x201   : > { %v2377_v6 = vor.u32 %v2539_v3, %v2376_v2  ;;  %v2528_v9 = vld [vmem:[%s3213_s11 + $0x24] sm:$0xf]  ;;  %v2338_v10 = vld [vmem:[%s3213_s11 + $0x28] sm:$0xf0]  ;;  %v2337_v13 = vor.u32 %v2529_v8, %v2336_v7  ;;  %v2344_v16 = vld [vmem:[%s3213_s11 + $0x30] sm:$0xf] }
 0x202   : > { %1539 = vmatpush.bf16.msra.mxu1 %v2554_v40  ;;  %v2536_v11 = vld [vmem:[%s3213_s11 + $0x64] sm:$0xf]  ;;  %v2370_v12 = vld [vmem:[%s3213_s11 + $0x68] sm:$0xf0]  ;;  %v2341_v14 = vor.u32 %v2528_v9, %v2338_v10  ;;  %v2531_v17 = vld [vmem:[%s3213_s11 + $0x34] sm:$0xf0] }
 0x203   : > { %v2373_v15 = vor.u32 %v2536_v11, %v2370_v12  ;;  %v2530_v18 = vld [vmem:[%s3213_s11 + $0x34] sm:$0xf]  ;;  %v2346_v19 = vld [vmem:[%s3213_s11 + $0x38] sm:$0xf0]  ;;  %v2345_v22 = vor.u32 %v2531_v17, %v2344_v16  ;;  %v2352_v25 = vld [vmem:[%s3213_s11 + $0x40] sm:$0xf] }
 0x204   : > { %1492 = vmatpush.bf16.msra.mxu0 %v2544_v43  ;;  %2613 = vmatpush.bf16.msra.mxu3 %v2544_v43  ;;  %v2538_v20 = vld [vmem:[%s3213_s11 + $0x74] sm:$0xf]  ;;  %v2378_v21 = vld [vmem:[%s3213_s11 + $0x78] sm:$0xf0]  ;;  %v2349_v23 = vor.u32 %v2530_v18, %v2346_v19  ;;  %v2533_v26 = vld [vmem:[%s3213_s11 + $0x44] sm:$0xf0] }
 0x205   : > { %v2381_v24 = vor.u32 %v2538_v20, %v2378_v21  ;;  %v2532_v27 = vld [vmem:[%s3213_s11 + $0x44] sm:$0xf]  ;;  %v2354_v28 = vld [vmem:[%s3213_s11 + $0x48] sm:$0xf0]  ;;  %v2353_v29 = vor.u32 %v2533_v26, %v2352_v25  ;;  %v2360_v31 = vld [vmem:[%s3213_s11 + $0x50] sm:$0xf] }
 0x206   : > { %1540 = vmatpush.bf16.msra.mxu1 %v2553_v42  ;;  %v2357_v30 = vor.u32 %v2532_v27, %v2354_v28  ;;  %v2535_v32 = vld [vmem:[%s3213_s11 + $0x54] sm:$0xf0]  ;;  %v2534_v33 = vld [vmem:[%s3213_s11 + $0x54] sm:$0xf]  ;;  %v2362_v34 = vld [vmem:[%s3213_s11 + $0x58] sm:$0xf0] }
 0x207   : > { %v2361_v35 = vor.u32 %v2535_v32, %v2360_v31  ;;  %v2365_v36 = vor.u32 %v2534_v33, %v2362_v34  ;;  %v2557_v37 = vld [vmem:[%s3249_s12 + $0x8] sm:$0xff]  ;;  %s3445_s4 = sshra.s32 %s2316_s9, 3  ;;  %p1869_p12 = scmp.eq.s32.totalorder %s3713_s30, 1 }
 0x208   : > { %1493 = vmatpush.bf16.msra.mxu0 %v2543_v45  ;;  %2614 = vmatpush.bf16.msra.mxu3 %v2543_v45  ;;  %s2317_s20 = sshll.u32 %s3445_s4, 2  ;;  %p2463_p13 = scmp.ne.s32.totalorder %s3713_s30, 1 }
 0x209   : > { %1676 = vmatpush.bf16.msra.mxu2 %v2557_v37  ;;  %s3450_s7 = scalar_lea.vmem [#allocation2], %s2317_s20  ;;  %s3509_s11 = scalar_lea.vmem [#allocation3], %s2317_s20 }
 0x20a   : > { %1541 = vmatpush.bf16.msra.mxu1 %v2552_v44  ;;  %v2563_v39 = vld [vmem:[%s3450_s7] sm:$0xff]   ;;  %v2594_v53 = vld [vmem:[%s3450_s7 + $0x8] sm:$0xff]  }
 0x20b   : > { %v2565_v45 = vunpack.c.h.bf16 %v2563_v39  ;;  %v2568_v57 = vunpack.c.l.bf16 %v2594_v53  ;;  %v2569_v62 = vunpack.c.h.bf16 %v2594_v53 }
 0x20c   : > { %1494 = vmatpush.bf16.msra.mxu0 %v2542_v47  ;;  %2615 = vmatpush.bf16.msra.mxu3 %v2542_v47 }
 0x20e   : > { %1542 = vmatpush.bf16.msra.mxu1 %v2551_v46 }
 0x210   : > { %1495 = vmatpush.bf16.msra.mxu0 %v2541_v49  ;;  %2616 = vmatpush.bf16.msra.mxu3 %v2541_v49 }
 0x212   : > { %1543 = vmatpush.bf16.msra.mxu1 %v2550_v48 }
 0x214   : > { %1496 = vmatpush.bf16.msra.mxu0 %v2540_v51  ;;  %2617 = vmatpush.bf16.msra.mxu3 %v2540_v51 }
 0x216   : > { %1544 = vmatpush.bf16.msra.mxu1 %v2549_v50 }
 0x217   : > { %1497 = vmatmul.bf16.vlgmr.msra.gmra.mxu0 %v2321_v59  ;;  %1527 = vmatmul.bf16.vlgmr.msra.gmra.mxu3 %v2369_v61 }
 0x218   : > { %2618 = vmatpush.bf16.msrb.mxu3 %v2555_v38  ;;  %v2556_v38 = vld [vmem:[%s3249_s12] sm:$0xff] }
 0x219   : > { %1677 = vmatpush.bf16.msra.mxu2 %v2556_v38 }
 0x21a   : > { %1545 = vmatpush.bf16.msra.mxu1 %v2548_v52 }
 0x21c   : > { %2619 = vmatpush.bf16.msrb.mxu3 %v2554_v40  ;;  %v2564_v40 = vunpack.c.l.bf16 %v2563_v39  ;;  %v2597_v39 = vld [vmem:[%s3450_s7 + $0x20] sm:$0xff]  }
 0x21d   : > { %1546 = vmatmul.bf16.vlgmr.msra.gmra.mxu1 %v2325_v60 }
 0x220   : > { %2620 = vmatpush.bf16.msrb.mxu3 %v2553_v42 }
 0x224   : > { %2621 = vmatpush.bf16.msrb.mxu3 %v2552_v44  ;;  %v3455_v44 = vld [vmem:[%s477_s29] sm:$0xf] }
 0x225   : > { %v3458_v47 = vperm.slane %v3455_v44, 0 }
 0x227   : > { %1502 = vmatmul.bf16.gmra.mxu0 %v2329_v4  ;;  %1532 = vmatmul.bf16.gmra.mxu3 %v2377_v6 }
 0x228   : > { %2622 = vmatpush.bf16.msrb.mxu3 %v2551_v46 }
 0x22c   : > { %2623 = vmatpush.bf16.msrb.mxu3 %v2550_v48 }
 0x22d   : > { %1551 = vmatmul.bf16.gmra.mxu1 %v2333_v5  ;;  %v2595_v5 = vld [vmem:[%s3450_s7 + $0x10] sm:$0xff]  }
 0x22e   : > { %v2572_v9 = vunpack.c.l.bf16 %v2595_v5 }
 0x230   : > { %2624 = vmatpush.bf16.msrb.mxu3 %v2549_v50 }
 0x234   : > { %2625 = vmatpush.bf16.msrb.mxu3 %v2548_v52 }
 0x237   : > { %1507 = vmatmul.bf16.gmra.mxu0 %v2337_v13  ;;  %1576 = vmatmul.bf16.vlgmr.msrb.gmra.mxu3 %v2373_v15 }
 0x23d   : > { %1556 = vmatmul.bf16.gmra.mxu1 %v2341_v14  ;;  %v2573_v14 = vunpack.c.h.bf16 %v2595_v5 }
 0x247   : > { %1512 = vmatmul.bf16.gmra.mxu0 %v2345_v22  ;;  %1581 = vmatmul.bf16.gmra.mxu3 %v2381_v24  ;;  %v2596_v22 = vld [vmem:[%s3450_s7 + $0x18] sm:$0xff]  }
 0x248   : > { %v2576_v26 = vunpack.c.l.bf16 %v2596_v22  ;;  %v2577_v32 = vunpack.c.h.bf16 %v2596_v22 }
 0x24d   : > { %1561 = vmatmul.bf16.gmra.mxu1 %v2349_v23 }
 0x257   : > { %1517 = vmatmul.bf16.gmra.mxu0 %v2353_v29 }
 0x25d   : > { %1566 = vmatmul.bf16.gmra.mxu1 %v2357_v30 }
 0x267   : > { %1522 = vmatmul.bf16.gmra.mxu0 %v2361_v35 }
 0x26d   : > { %1571 = vmatmul.bf16.gmra.mxu1 %v2365_v36 }
 0x294   : > { %v1498_v41 = vpop.f32.mrf.mxu0 }
 0x295   : > { %v1499_v43 = vadd.f32 %v2564_v40, %v1498_v41 }
 0x29a   : > { %v1547_v42 = vpop.f32.mrf.mxu1  ;;  %v3468_v19 = vpop.f32.mrf.mxu3 }
 0x29b   : > { %v1548_v46 = vadd.f32 %v1547_v42, %v1499_v43 }
 0x29c   : > { %v1500_v48 = vpop.f32.mrf.mxu0 }
 0x29d   : > { %v1501_v50 = vadd.f32 %v2565_v45, %v1500_v48  ;;  %v1588_v51 = vadd.f32 %v3458_v47, %v1548_v46  ;;  %v2580_v45 = vunpack.c.l.bf16 %v2597_v39 }
 0x29f   : > { %v1604_v55 = vmax.f32 %v1588_v51, 0.0  ;;  %v2581_v51 = vunpack.c.h.bf16 %v2597_v39 }
 0x2a2   : > { %v1549_v49 = vpop.f32.mrf.mxu1  ;;  %v1530_v31 = vpop.f32.mrf.mxu3 }
 0x2a3   : > { %v1550_v52 = vadd.f32 %v1549_v49, %v1501_v50 }
 0x2a4   : > { %v1503_v58 = vpop.f32.mrf.mxu0 }
 0x2a5   : > { %v1589_v54 = vadd.f32 %v3458_v47, %v1550_v52  ;;  %v1504_v61 = vadd.f32 %v2568_v57, %v1503_v58 }
 0x2a7   : > { %v1605_v56 = vmax.f32 %v1589_v54, 0.0 }
 0x2a9   : > { %v1620_v60 = vpack.c.bf16 %v1605_v56, %v1604_v55 }
 0x2aa   : > { %v1552_v59 = vpop.f32.mrf.mxu1  ;;  %v1533_v41 = vpop.f32.mrf.mxu3 }
 0x2ab   : > { %2454 = vmatmul.msk.bf16.vlgmr.msra.gmra.mxu2 %vm1645_vm4, %v1620_v60  ;;  %v1553_v63 = vadd.f32 %v1552_v59, %v1504_v61  ;;  %v2598_v59 = vld [vmem:[%s3450_s7 + $0x28] sm:$0xff]  }
 0x2ac   : > { %v1505_v0 = vpop.f32.mrf.mxu0  ;;  %v2585_v5 = vunpack.c.h.bf16 %v2598_v59 }
 0x2ad   : > { %v1506_v2 = vadd.f32 %v2569_v62, %v1505_v0  ;;  %v1590_v3 = vadd.f32 %v3458_v47, %v1553_v63  ;;  %v2584_v63 = vunpack.c.l.bf16 %v2598_v59 }
 0x2af   : > { %v1606_v7 = vmax.f32 %v1590_v3, 0.0 }
 0x2b2   : > { %v1554_v1 = vpop.f32.mrf.mxu1  ;;  %v1535_v56 = vpop.f32.mrf.mxu3 }
 0x2b3   : > { %v1555_v4 = vadd.f32 %v1554_v1, %v1506_v2 }
 0x2b4   : > { %v1508_v10 = vpop.f32.mrf.mxu0 }
 0x2b5   : > { %v1591_v6 = vadd.f32 %v3458_v47, %v1555_v4  ;;  %v1509_v13 = vadd.f32 %v2572_v9, %v1508_v10  ;;  %v2599_v9 = vld [vmem:[%s3450_s7 + $0x30] sm:$0xff]  }
 0x2b7   : > { %v1607_v8 = vmax.f32 %v1591_v6, 0.0 }
 0x2b9   : > { %v1621_v12 = vpack.c.bf16 %v1607_v8, %v1606_v7 }
 0x2ba   : > { %v1557_v11 = vpop.f32.mrf.mxu1  ;;  %v1577_v4 = vpop.f32.mrf.mxu3 }
 0x2bb   : > { %2455 = vmatmul.msk.bf16.gmra.mxu2 %vm1645_vm4, %v1621_v12  ;;  %v1558_v15 = vadd.f32 %v1557_v11, %v1509_v13  ;;  %v2588_v13 = vunpack.c.l.bf16 %v2599_v9 }
 0x2bc   : > { %v1510_v16 = vpop.f32.mrf.mxu0 }
 0x2bd   : > { %v1511_v18 = vadd.f32 %v2573_v14, %v1510_v16  ;;  %v1592_v20 = vadd.f32 %v3458_v47, %v1558_v15  ;;  %v2589_v14 = vunpack.c.h.bf16 %v2599_v9 }
 0x2bf   : > { %v1608_v24 = vmax.f32 %v1592_v20, 0.0  ;;  %v1529_v20 = vadd.f32 %v2588_v13, %v3468_v19 }
 0x2c2   : > { %v1559_v17 = vpop.f32.mrf.mxu1  ;;  %v1579_v16 = vpop.f32.mrf.mxu3 }
 0x2c3   : > { %v1560_v21 = vadd.f32 %v1559_v17, %v1511_v18 }
 0x2c4   : > { %v1513_v27 = vpop.f32.mrf.mxu0 }
 0x2c5   : > { %v1593_v23 = vadd.f32 %v3458_v47, %v1560_v21  ;;  %v1514_v30 = vadd.f32 %v2576_v26, %v1513_v27  ;;  %v1531_v21 = vadd.f32 %v2589_v14, %v1530_v31 }
 0x2c7   : > { %v1609_v25 = vmax.f32 %v1593_v23, 0.0  ;;  %v1578_v23 = vadd.f32 %v1577_v4, %v1529_v20 }
 0x2c9   : > { %v1622_v29 = vpack.c.bf16 %v1609_v25, %v1608_v24  ;;  %v1580_v24 = vadd.f32 %v1579_v16, %v1531_v21  ;;  %v1600_v26 = vadd.f32 %v3458_v47, %v1578_v23 }
 0x2ca   : > { %v1562_v28 = vpop.f32.mrf.mxu1  ;;  %v1582_v25 = vpop.f32.mrf.mxu3 }
 0x2cb   : > { %2456 = vmatmul.msk.bf16.gmra.mxu2 %vm1645_vm4, %v1622_v29  ;;  %v1563_v33 = vadd.f32 %v1562_v28, %v1514_v30  ;;  %v1601_v27 = vadd.f32 %v3458_v47, %v1580_v24  ;;  %v2600_v28 = vld [vmem:[%s3450_s7 + $0x38] sm:$0xff]  }
 0x2cc   : > { %v1515_v34 = vpop.f32.mrf.mxu0  ;;  %v2592_v29 = vunpack.c.l.bf16 %v2600_v28  ;;  %v2593_v30 = vunpack.c.h.bf16 %v2600_v28 }
 0x2cd   : > { %v1516_v36 = vadd.f32 %v2577_v32, %v1515_v34  ;;  %v1594_v37 = vadd.f32 %v3458_v47, %v1563_v33  ;;  %v1616_v32 = vmax.f32 %v1600_v26, 0.0  ;;  %v1617_v33 = vmax.f32 %v1601_v27, 0.0 }
 0x2ce   : > { %v1534_v34 = vadd.f32 %v2592_v29, %v1533_v41 }
 0x2cf   : > { %v1610_v42 = vmax.f32 %v1594_v37, 0.0 }
 0x2d0   : > { %v1583_v31 = vadd.f32 %v1582_v25, %v1534_v34 }
 0x2d2   : > { %v1564_v35 = vpop.f32.mrf.mxu1  ;;  %v1584_v19 = vpop.f32.mrf.mxu3 }
 0x2d3   : > { %v1565_v38 = vadd.f32 %v1564_v35, %v1516_v36  ;;  %v1536_v35 = vadd.f32 %v2593_v30, %v1535_v56  ;;  %v1626_v36 = vpack.c.bf16 %v1617_v33, %v1616_v32 }
 0x2d4   : > { %v1518_v46 = vpop.f32.mrf.mxu0 }
 0x2d5   : > { %v1595_v40 = vadd.f32 %v3458_v47, %v1565_v38  ;;  %v1519_v50 = vadd.f32 %v2580_v45, %v1518_v46  ;;  %v1585_v37 = vadd.f32 %v1584_v19, %v1536_v35  ;;  %v1602_v38 = vadd.f32 %v3458_v47, %v1583_v31 }
 0x2d6   : > { %v3495_v45 = vperm.slane %v3455_v44, 1 }
 0x2d7   : > { %v1611_v43 = vmax.f32 %v1595_v40, 0.0  ;;  %v1603_v39 = vadd.f32 %v3458_v47, %v1585_v37  ;;  %v1618_v40 = vmax.f32 %v1602_v38, 0.0 }
 0x2d9   : > { %v1623_v49 = vpack.c.bf16 %v1611_v43, %v1610_v42  ;;  %v1619_v42 = vmax.f32 %v1603_v39, 0.0 }
 0x2da   : > { %v1567_v48 = vpop.f32.mrf.mxu1 }
 0x2db   : > { %2457 = vmatmul.msk.bf16.gmra.mxu2 %vm1645_vm4, %v1623_v49  ;;  %v1568_v52 = vadd.f32 %v1567_v48, %v1519_v50  ;;  %v1627_v43 = vpack.c.bf16 %v1619_v42, %v1618_v40  ;;  %v3499_v48 = vperm.slane %v3455_v44, 2  ;;  %v3502_v50 = vperm.slane %v3455_v44, 3 }
 0x2dc   : > { %v1520_v53 = vpop.f32.mrf.mxu0 }
 0x2dd   : > { %v1521_v55 = vadd.f32 %v2581_v51, %v1520_v53  ;;  %v1596_v57 = vadd.f32 %v3458_v47, %v1568_v52 }
 0x2df   : > { %v1612_v61 = vmax.f32 %v1596_v57, 0.0 }
 0x2e2   : > { %v1569_v54 = vpop.f32.mrf.mxu1 }
 0x2e3   : > { %v1570_v58 = vadd.f32 %v1569_v54, %v1521_v55 }
 0x2e4   : > { %v1523_v0 = vpop.f32.mrf.mxu0 }
 0x2e5   : > { %v1597_v60 = vadd.f32 %v3458_v47, %v1570_v58  ;;  %v1524_v3 = vadd.f32 %v2584_v63, %v1523_v0 }
 0x2e7   : > { %v1613_v62 = vmax.f32 %v1597_v60, 0.0 }
 0x2e9   : > { %v1624_v2 = vpack.c.bf16 %v1613_v62, %v1612_v61 }
 0x2ea   : > { %v1572_v1 = vpop.f32.mrf.mxu1 }
 0x2eb   : > { %2458 = vmatmul.msk.bf16.gmra.mxu2 %vm1645_vm4, %v1624_v2  ;;  %v1573_v6 = vadd.f32 %v1572_v1, %v1524_v3 }
 0x2ec   : > { %v1525_v7 = vpop.f32.mrf.mxu0 }
 0x2ed   : > { %v1526_v8 = vadd.f32 %v2585_v5, %v1525_v7  ;;  %v1598_v11 = vadd.f32 %v3458_v47, %v1573_v6 }
 0x2ef   : > { %v1614_v17 = vmax.f32 %v1598_v11, 0.0 }
 0x2f2   : > { %v1574_v10 = vpop.f32.mrf.mxu1 }
 0x2f3   : > { %v1575_v12 = vadd.f32 %v1574_v10, %v1526_v8 }
 0x2f5   : > { %v1599_v15 = vadd.f32 %v3458_v47, %v1575_v12 }
 0x2f7   : > { %v1615_v18 = vmax.f32 %v1599_v15, 0.0 }
 0x2f9   : > { %v1625_v22 = vpack.c.bf16 %v1615_v18, %v1614_v17 }
 0x2fb   : > { %2459 = vmatmul.msk.bf16.gmra.mxu2 %vm1645_vm4, %v1625_v22 }
 0x30b   : > { %2460 = vmatmul.msk.bf16.gmra.mxu2 %vm1645_vm4, %v1626_v36 }
 0x31b   : > { %2461 = vmatmul.msk.bf16.gmra.mxu2 %vm1645_vm4, %v1627_v43 }
 0x32e   : > { %v1679_v41 = vpop.f32.mrf.mxu2 }
 0x32f   : > { %v1680_v46 = vadd.f32 %v1679_v41, %v3495_v45 }
 0x331   : > { %v1719_v49 = vmax.f32 %v1680_v46, 0.0 }
 0x333   : > { %v1736_v47 = vmul.f32 %v3499_v48, %v1719_v49 }
 0x335   : > { %v1753_v51 = vadd.f32 %v3502_v50, %v1736_v47 }
 0x336   : > { %v1681_v52 = vpop.f32.mrf.mxu2 }
 0x337   : > { %v1769_v53 = vpack.c.bf16 %v1753_v51, %v1753_v51  ;;  %v1682_v54 = vadd.f32 %v1681_v52, %v3495_v45 }
 0x339   : > { %1788 = vst.msk [vmem:[%s3509_s11] sm:$0xf] %vm1787_vm5, %v1769_v53  ;;  %v1720_v55 = vmax.f32 %v1682_v54, 0.0  ;;  %v1822_v61 = vunpack.c.l.b16 %v1769_v53 }
 0x33b   : > { %v1737_v44 = vmul.f32 %v3499_v48, %v1720_v55 }
 0x33d   : > { %v1754_v56 = vadd.f32 %v3502_v50, %v1737_v44 }
 0x33e   : > { %v1684_v57 = vpop.f32.mrf.mxu2 }
 0x33f   : > { %v1770_v58 = vpack.c.bf16 %v1754_v56, %v1754_v56  ;;  %v1685_v59 = vadd.f32 %v1684_v57, %v3495_v45 }
 0x341   : > { %1789 = vst.msk [vmem:[%s3509_s11 + $0x4] sm:$0xf] %vm1787_vm5, %v1770_v58  ;;  %v1721_v60 = vmax.f32 %v1685_v59, 0.0  ;;  %v1823_v62 = vunpack.c.l.b16 %v1770_v58 }
 0x343   : > { %v1738_v63 = vmul.f32 %v3499_v48, %v1721_v60  ;;  %v3519_v0 = vpack.c.b16 %v1823_v62, %v1822_v61 }
 0x345   : > { %v1755_v1 = vadd.f32 %v3502_v50, %v1738_v63 }
 0x346   : > { %v1686_v2 = vpop.f32.mrf.mxu2 }
 0x347   : > { %v1771_v3 = vpack.c.bf16 %v1755_v1, %v1755_v1  ;;  %v1687_v4 = vadd.f32 %v1686_v2, %v3495_v45 }
 0x349   : > { %1790 = vst.msk [vmem:[%s3509_s11 + $0x8] sm:$0xf] %vm1787_vm5, %v1771_v3  ;;  %v1722_v5 = vmax.f32 %v1687_v4, 0.0  ;;  %v1824_v12 = vunpack.c.l.b16 %v1771_v3 }
 0x34b   : > { %v1739_v6 = vmul.f32 %v3499_v48, %v1722_v5 }
 0x34d   : > { %v1756_v7 = vadd.f32 %v3502_v50, %v1739_v6 }
 0x34e   : > { %v1689_v8 = vpop.f32.mrf.mxu2 }
 0x34f   : > { %v1772_v9 = vpack.c.bf16 %v1756_v7, %v1756_v7  ;;  %v1690_v10 = vadd.f32 %v1689_v8, %v3495_v45 }
 0x351   : > { %1791 = vst.msk [vmem:[%s3509_s11 + $0xc] sm:$0xf] %vm1787_vm5, %v1772_v9  ;;  %v1723_v11 = vmax.f32 %v1690_v10, 0.0  ;;  %v1825_v13 = vunpack.c.l.b16 %v1772_v9 }
 0x353   : > { %v1740_v14 = vmul.f32 %v3499_v48, %v1723_v11  ;;  %v3531_v15 = vpack.c.b16 %v1825_v13, %v1824_v12 }
 0x355   : > { %v1757_v16 = vadd.f32 %v3502_v50, %v1740_v14 }
 0x356   : > { %v1691_v17 = vpop.f32.mrf.mxu2 }
 0x357   : > { %v1773_v18 = vpack.c.bf16 %v1757_v16, %v1757_v16  ;;  %v1692_v20 = vadd.f32 %v1691_v17, %v3495_v45 }
 0x359   : > { %1792 = vst.msk [vmem:[%s3509_s11 + $0x10] sm:$0xf] %vm1787_vm5, %v1773_v18  ;;  %v1724_v21 = vmax.f32 %v1692_v20, 0.0  ;;  %v1826_v28 = vunpack.c.l.b16 %v1773_v18 }
 0x35b   : > { %v1741_v22 = vmul.f32 %v3499_v48, %v1724_v21 }
 0x35d   : > { %v1758_v23 = vadd.f32 %v3502_v50, %v1741_v22 }
 0x35e   : > { %v1694_v24 = vpop.f32.mrf.mxu2 }
 0x35f   : > { %v1774_v25 = vpack.c.bf16 %v1758_v23, %v1758_v23  ;;  %v1695_v26 = vadd.f32 %v1694_v24, %v3495_v45 }
 0x361   : > { %1793 = vst.msk [vmem:[%s3509_s11 + $0x14] sm:$0xf] %vm1787_vm5, %v1774_v25  ;;  %v1725_v27 = vmax.f32 %v1695_v26, 0.0  ;;  %v1827_v29 = vunpack.c.l.b16 %v1774_v25 }
 0x363   : > { %v1742_v30 = vmul.f32 %v3499_v48, %v1725_v27  ;;  %v3543_v32 = vpack.c.b16 %v1827_v29, %v1826_v28 }
 0x365   : > { %v1759_v33 = vadd.f32 %v3502_v50, %v1742_v30 }
 0x366   : > { %v1696_v34 = vpop.f32.mrf.mxu2 }
 0x367   : > { %v1775_v35 = vpack.c.bf16 %v1759_v33, %v1759_v33  ;;  %v1697_v36 = vadd.f32 %v1696_v34, %v3495_v45 }
 0x369   : > { %1794 = vst.msk [vmem:[%s3509_s11 + $0x18] sm:$0xf] %vm1787_vm5, %v1775_v35  ;;  %v1726_v19 = vmax.f32 %v1697_v36, 0.0  ;;  %v1828_v43 = vunpack.c.l.b16 %v1775_v35 }
 0x36b   : > { %v1743_v31 = vmul.f32 %v3499_v48, %v1726_v19 }
 0x36d   : > { %v1760_v37 = vadd.f32 %v3502_v50, %v1743_v31 }
 0x36e   : > { %v1699_v38 = vpop.f32.mrf.mxu2 }
 0x36f   : > { %v1776_v39 = vpack.c.bf16 %v1760_v37, %v1760_v37  ;;  %v1700_v40 = vadd.f32 %v1699_v38, %v3495_v45 }
 0x371   : > { %1795 = vst.msk [vmem:[%s3509_s11 + $0x1c] sm:$0xf] %vm1787_vm5, %v1776_v39  ;;  %v1727_v42 = vmax.f32 %v1700_v40, 0.0  ;;  %v1829_v41 = vunpack.c.l.b16 %v1776_v39 }
 0x373   : > { %v1744_v46 = vmul.f32 %v3499_v48, %v1727_v42  ;;  %v3555_v49 = vpack.c.b16 %v1829_v41, %v1828_v43  ;;  %v1805_v42 = vld [vmem:[%s3221_s8] sm:$0xf]  ;;  %v1804_v43 = vld [vmem:[#allocation4] sm:$0xff] }
 0x375   : > { %v1761_v47 = vadd.f32 %v3502_v50, %v1744_v46 }
 0x376   : > { %v1701_v51 = vpop.f32.mrf.mxu2 }
 0x377   : > { %v3558_v52 = vpack.c.bf16 %v1761_v47, %v1761_v47  ;;  %v1702_v53 = vadd.f32 %v1701_v51, %v3495_v45 }
 0x379   : > { %1796 = vst.msk [vmem:[%s3509_s11 + $0x20] sm:$0xf] %vm1787_vm5, %v3558_v52  ;;  %v1728_v54 = vmax.f32 %v1702_v53, 0.0 }
 0x37b   : > { %v1745_v55 = vmul.f32 %v3499_v48, %v1728_v54 }
 0x37d   : > { %v1762_v44 = vadd.f32 %v3502_v50, %v1745_v55 }
 0x37e   : > { %v1704_v56 = vpop.f32.mrf.mxu2 }
 0x37f   : > { %v1778_v57 = vpack.c.bf16 %v1762_v44, %v1762_v44  ;;  %v1705_v58 = vadd.f32 %v1704_v56, %v3495_v45 }
 0x381   : > { %1797 = vst.msk [vmem:[%s3509_s11 + $0x24] sm:$0xf] %vm1787_vm5, %v1778_v57  ;;  %v1729_v59 = vmax.f32 %v1705_v58, 0.0  ;;  %v1831_v40 = vunpack.c.l.b16 %v1778_v57 }
 0x383   : > { %v1746_v60 = vmul.f32 %v3499_v48, %v1729_v59 }
 0x385   : > { %v1763_v61 = vadd.f32 %v3502_v50, %v1746_v60 }
 0x386   : > { %v1706_v62 = vpop.f32.mrf.mxu2 }
 0x387   : > { %v1779_v63 = vpack.c.bf16 %v1763_v61, %v1763_v61  ;;  %v1707_v1 = vadd.f32 %v1706_v62, %v3495_v45 }
 0x389   : > { %1798 = vst.msk [vmem:[%s3509_s11 + $0x28] sm:$0xf] %vm1787_vm5, %v1779_v63  ;;  %v1730_v2 = vmax.f32 %v1707_v1, 0.0  ;;  %v1832_v38 = vunpack.c.l.b16 %v1779_v63 }
 0x38b   : > { %v1747_v3 = vmul.f32 %v3499_v48, %v1730_v2 }
 0x38d   : > { %v1764_v4 = vadd.f32 %v3502_v50, %v1747_v3 }
 0x38e   : > { %v1709_v5 = vpop.f32.mrf.mxu2 }
 0x38f   : > { %v1780_v6 = vpack.c.bf16 %v1764_v4, %v1764_v4  ;;  %v1710_v7 = vadd.f32 %v1709_v5, %v3495_v45 }
 0x391   : > { %1799 = vst.msk [vmem:[%s3509_s11 + $0x2c] sm:$0xf] %vm1787_vm5, %v1780_v6  ;;  %v1731_v8 = vmax.f32 %v1710_v7, 0.0 }
 0x393   : > { %v1748_v9 = vmul.f32 %v3499_v48, %v1731_v8 }
 0x395   : > { %v1765_v10 = vadd.f32 %v3502_v50, %v1748_v9 }
 0x396   : > { %v1711_v11 = vpop.f32.mrf.mxu2 }
 0x397   : > { %v1781_v12 = vpack.c.bf16 %v1765_v10, %v1765_v10  ;;  %v1712_v13 = vadd.f32 %v1711_v11, %v3495_v45 }
 0x399   : > { %1800 = vst.msk [vmem:[%s3509_s11 + $0x30] sm:$0xf] %vm1787_vm5, %v1781_v12  ;;  %v1732_v14 = vmax.f32 %v1712_v13, 0.0  ;;  %v1834_v31 = vunpack.c.l.b16 %v1781_v12 }
 0x39b   : > { %v1749_v16 = vmul.f32 %v3499_v48, %v1732_v14 }
 0x39d   : > { %v1766_v17 = vadd.f32 %v3502_v50, %v1749_v16 }
 0x39e   : > { %v1714_v18 = vpop.f32.mrf.mxu2 }
 0x39f   : > { %v1782_v20 = vpack.c.bf16 %v1766_v17, %v1766_v17  ;;  %v1715_v21 = vadd.f32 %v1714_v18, %v3495_v45 }
 0x3a1   : > { %1801 = vst.msk [vmem:[%s3509_s11 + $0x34] sm:$0xf] %vm1787_vm5, %v1782_v20  ;;  %v1733_v22 = vmax.f32 %v1715_v21, 0.0  ;;  %v1835_v19 = vunpack.c.l.b16 %v1782_v20 }
 0x3a3   : > { %v1750_v23 = vmul.f32 %v3499_v48, %v1733_v22  ;;  %v1844_v37 = vpack.c.b16 %v1835_v19, %v1834_v31 }
 0x3a5   : > { %v1767_v24 = vadd.f32 %v3502_v50, %v1750_v23 }
 0x3a6   : > { %v1716_v25 = vpop.f32.mrf.mxu2 }
 0x3a7   : > { %v1783_v26 = vpack.c.bf16 %v1767_v24, %v1767_v24  ;;  %v1717_v27 = vadd.f32 %v1716_v25, %v3495_v45  ;;  %v1833_v45 = vunpack.c.l.b16 %v1780_v6 }
 0x3a9   : > { %1802 = vst.msk [vmem:[%s3509_s11 + $0x38] sm:$0xf] %vm1787_vm5, %v1783_v26  ;;  %v1734_v28 = vmax.f32 %v1717_v27, 0.0  ;;  %v1836_v34 = vunpack.c.l.b16 %v1783_v26  ;;  %v1843_v39 = vpack.c.b16 %v1833_v45, %v1832_v38 }
 0x3ab   : > { %v1751_v29 = vmul.f32 %v3499_v48, %v1734_v28  ;;  %v1830_v48 = vunpack.c.l.b16 %v3558_v52 }
 0x3ad   : > { %v1768_v30 = vadd.f32 %v3502_v50, %v1751_v29  ;;  %v1842_v50 = vpack.c.b16 %v1831_v40, %v1830_v48 }
 0x3af   : > { %v1784_v33 = vpack.c.bf16 %v1768_v30, %v1768_v30 }
 0x3b1   : > { %1803 = vst.msk [vmem:[%s3509_s11 + $0x3c] sm:$0xf] %vm1787_vm5, %v1784_v33  ;;  %v1837_v35 = vunpack.c.l.b16 %v1784_v33 }
 0x3b3   : > { %v1845_v36 = vpack.c.b16 %v1837_v35, %v1836_v34 }
 0x3b5   : > { %1854 = vmatpush.bf16.msra.mxu3 %v1845_v36 }
 0x3b9   : > { %1855 = vmatpush.bf16.msra.mxu3 %v1844_v37 }
 0x3bd   : > { %1856 = vmatpush.bf16.msra.mxu3 %v1843_v39 }
 0x3c1   : > { %1857 = vmatpush.bf16.msra.mxu3 %v1842_v50 }
 0x3c5   : > { %1858 = vmatpush.bf16.msra.mxu3 %v3555_v49 }
 0x3c9   : > { %1859 = vmatpush.bf16.msra.mxu3 %v3543_v32 }
 0x3cd   : > { %1860 = vmatpush.bf16.msra.mxu3 %v3531_v15 }
 0x3d1   : > { %1861 = vmatpush.bf16.msra.mxu3 %v3519_v0 }
 0x3d4   : > { %1862 = vmatmul.bf16.vlgmr.msra.gmra.mxu3 %v1805_v42 }
 0x457   : > { %v1863_v41 = vpop.f32.mrf.mxu3 }
 0x458   : > { %v1867_v46 = vadd.f32 %v1863_v41, %v1804_v43 }
 0x45a   : > { %1868 = vst.msk [vmem:[#allocation4] sm:$0xff] %vm1645_vm4, %v1867_v46 }
 0x45b   : > { %1872 = sbr.rel (%p2463_p13) target bundleno = 1262 (0x4ee), region = 96 }
 0x45f   : > { %v1865_v47 = vpop.f32.mrf.mxu3 }
 0x460   : > { %v2559_v49 = vld [vmem:[%s3254_s16 + $0x8] sm:$0xff]  ;;  %v2558_v32 = vld [vmem:[%s3254_s16] sm:$0xff] }
 0x461   : > { %1901 = vmatpush.bf16.msra.mxu0 %v2559_v49  ;;  %v1874_v15 = vld [vmem:[#allocation4] sm:$0xff]  ;;  %v1873_v0 = vld [vmem:[#allocation5] sm:$0xff] }
 0x462   : > { %v1875_v51 = vpack.c.bf16 %v1874_v15, %v1874_v15 }
 0x465   : > { %1902 = vmatpush.bf16.msra.mxu0 %v2558_v32 }
 0x468   : > { %2472 = vmatmul.msk.bf16.vlgmr.msra.gmra.mxu0 %vm1645_vm4, %v1875_v51 }
 0x4e5   : > { %v1904_v52 = vpop.f32.mrf.mxu0 }
 0x4e6   : > { %v1908_v53 = vadd.f32 %v1904_v52, %v1873_v0 }
 0x4e8   : > { %1909 = vst.msk [vmem:[#allocation5] sm:$0xff] %vm1645_vm4, %v1908_v53 }
 0x4ed   : > { %v1906_v54 = vpop.f32.mrf.mxu0 }
 0x4ee PF: > { %p1910_p1 = scmp.eq.s32.totalorder %s2962_s24, 2 }
 0x4f0   : > { %p1911_p3 = pnand %p1910_p1, %p1869_p12 }
 0x4f1   : > { %s3715_s12 = sld [smem:[#allocation29_spill]] (!%p1911_p3) }
 0x4f2   : > { %1914 = sbr.rel (%p1911_p3) target bundleno = 1666 (0x682), region = 100  ;;  %s3716_s2 = sld [smem:[#allocation28_spill]] (!%p1911_p3) }
 0x4f3   : > { %s3717_s22 = sld [smem:[#allocation31_spill]] (!%p1911_p3) }
 0x4f7   : > { %v2561_v55 = vld [vmem:[%s3715_s12 + $0x8] sm:$0xff]  ;;  %v2560_v57 = vld [vmem:[%s3715_s12] sm:$0xff]  ;;  %vm1959_vm6 = vcmask 31744  }
 0x4f8   : > { %v1915_v44 = vld [vmem:[#allocation5] sm:$0xff]  ;;  %v2746_v56 = vld [vmem:[%s3716_s2] ss:$0 sm:$0xff]  ;;  %1952 = vmatpush.bf16.msra.mxu0 %v2561_v55 }
 0x4f9   : > { %v1920_v58 = vadd.f32 %v2746_v56, %v1915_v44  ;;  %v2747_v61 = vld [vmem:[#allocation11] ss:$0 sm:$0xff] }
 0x4fb   : > { %v1921_v59 = vmax.f32 %v1920_v58, 0.0 }
 0x4fc   : > { %1953 = vmatpush.bf16.msra.mxu0 %v2560_v57 }
 0x4fd   : > { %v1922_v60 = vpack.c.bf16 %v1921_v59, %v1921_v59 }
 0x4ff   : > { %2481 = vmatmul.msk.bf16.vlgmr.msra.gmra.mxu0 %vm1645_vm4, %v1922_v60 }
 0x57c   : > { %v1955_v62 = vpop.f32.mrf.mxu0 }
 0x57d   : > { %v1956_v63 = vadd.f32 %v2747_v61, %v1955_v62 }
 0x57f   : > { %v1960_v1 = vsel %vm1959_vm6, %v1956_v63, -inf }
 0x580   : > { %1961 = vmax.xlane.f32.xlu0 %v1960_v1 }
 0x584   : > { %v1957_v2 = vpop.f32.mrf.mxu0 }
 0x5f3   : > { %v1962_v3 = vpop.xlane.xlu0 %1961 }
 0x5f4   : > { %v1963_v4 = vsub.f32 %v1956_v63, %v1962_v3 }
 0x5f6   : > { %v1964_v5 = vmul.f32 1.442695, %v1963_v4 }
 0x5f8   : > { %2748 = vpow2.f32 %v1964_v5 }
 0x5fe   : > { %v2749_v6 = vpop.eup %2748 }
 0x5ff   : > { %v1966_v7 = vsel %vm1959_vm6, %v2749_v6, 0.0 }
 0x600   : > { %1967 = vadd.xlane.f32.xlu0 %v1966_v7 }
 0x673   : > { %v1968_v8 = vpop.xlane.xlu0 %1967 }
 0x674   : > { %2750 = vlog2.f32 %v1968_v8 }
 0x67a   : > { %v2751_v9 = vpop.eup %2750 }
 0x67b   : > { %v1970_v10 = vmul.f32 0.6931472, %v2751_v9 }
 0x67d   : > { %v1971_v11 = vadd.f32 %v1970_v10, %v1962_v3 }
 0x67f   : > { %v1972_v12 = vsub.f32 %v1956_v63, %v1971_v11 }
 0x681   : > { %1973 = vst.msk [vmem:[%s3717_s22] sm:$0xff] %vm1959_vm6, %v1972_v12 }
 0x682 PF: > { %s28_s27 = sadd.s32 1, %s2974_s27   ;;  %s3718_s23 = sld [smem:[#allocation17_spill]] }
 0x683   : > { %p25_p4 = scmp.ge.s32.totalorder %s28_s27, 8   ;;  %s3719_s22 = sld [smem:[#allocation21_spill]] }
 0x684   : > { %s3720_s14 = sld [smem:[#allocation19_spill]]  ;;  %s3722_s30 = smov %s3737_s25 }
 0x685   : > { %s3721_s3 = sld [smem:[#allocation20_spill]]  ;;  %s3723_s17 = smov %s2938_s18 }
 0x686   : > { %s3724_s18 = smov %s2942_s19  ;;  %s3725_s19 = smov %s3205_s28 }
 0x687   : > { %s3726_s20 = smov %s2950_s21  ;;  %s3729_s24 = smov %s2970_s26 }
 0x688   : > { %s3727_s21 = smov %s3718_s23  ;;  %s3731_s26 = smov %s3722_s30 }
 0x689   :  { %27 = sbr.rel (!%p25_p4) target bundleno = 21 (0x15), region = 159 }
 0x68a   : > { %s3728_s23 = smov %s3720_s14 }
 0x68b   : > { %s3730_s25 = smov %s3721_s3 }
 0x68e   :  { %1985 = vsyncpa [#allocation7], 1 }
 0x68f   :  { %1987 = vsyncpa [#allocation7 + $0x1], 1 }
 0x690   :  { %1988 = vsyncpa [#allocation9], 1 }
 0x691   :  { %1990 = vsyncpa [#allocation9 + $0x1], 1 }
 0x692   :  { %1991 = vsyncpa [#allocation12], 1 }

</bundles_post_ra>
